<compile_context>
chip_gen: v6e
topology: v6e:2x2x1
jax: 0.10.0
libtpu: 0.0.40
codegen_flags: <defaults>
</compile_context>

<pallas_src>
import functools

import numpy as np
import jax
import jax.numpy as jnp
from jax.experimental import pallas as pl
from jax.experimental.pallas import tpu as pltpu


_VMEM_LIMIT = 32 * 1024 * 1024  # fits default scoped VMEM on v5e/v6e/v7x


def _round_up(x, m):
    return ((x + m - 1) // m) * m


# ----------------------------------------------------------------------------
# Fused conv-block kernel.
#
# The wrapper rearranges the zero-padded input into 4 parity grids
# (space-to-depth for stride 2), flattened to (4, Lpad, Cin).  For output
# "extended" pixel p = r*Wg + c (c == Wo is a junk column dropped outside):
#     out_ext[p, :] = sum_k  xg[g_k, p + off_k, :] @ W_k
# so every tap is a contiguous static slice -> 9 bf16 dots, f32 accumulation,
# then bias + LeakyReLU(0.2) + optional eval-BatchNorm affine, all in f32.
# ----------------------------------------------------------------------------
def _make_conv_kernel(taps, Lo, Cin, Cout, apply_affine, use_mxu):
    def kernel(x_ref, w_ref, b_ref, *rest):
        if apply_affine:
            s_ref, t_ref, o_ref = rest
        else:
            (o_ref,) = rest
        acc = jnp.zeros((Lo, Cout), jnp.float32)
        for k, (g, off) in enumerate(taps):
            tap = x_ref[0, g, pl.ds(off, Lo), :]            # (Lo, Cin) bf16
            if use_mxu:
                acc = acc + jnp.dot(tap, w_ref[k],
                                    preferred_element_type=jnp.float32)
            else:
                # tiny-Cin path (first layer, c_in=1): keep the MXU out of a
                # K=1 contraction, do VPU broadcast multiply-adds in f32.
                tap_f = tap.astype(jnp.float32)
                w_k = w_ref[k].astype(jnp.float32)          # (Cin, Cout)
                for c in range(Cin):
                    acc = acc + tap_f[:, c:c + 1] * w_k[c:c + 1, :]
        y = acc + b_ref[...]                                # (1, Cout) bcast
        y = jnp.where(y > 0, y, 0.2 * y)                    # LeakyReLU(0.2)
        # Dropout2d(0.25) is identity in eval mode.
        if apply_affine:                                    # eval BatchNorm
            y = y * s_ref[...] + t_ref[...]
        o_ref[0] = y
    return kernel


def conv_block_s2(x_nhwc, blk):
    """(B, H, W, Cin) -> (B, Ho, Wo, Cout) f32 with Ho=(H+1)//2, Wo=(W+1)//2."""
    B, H, W, Cin = x_nhwc.shape
    Cout = blk["cout"]
    Ho, Wo = (H + 1) // 2, (W + 1) // 2
    Hg, Wg = Ho + 1, Wo + 1
    L, Lo = Hg * Wg, Ho * Wg
    Lpad = L + Wg                                   # room for the largest tap slice

    # space-to-depth glue: reads the activation once (vs. 9x for im2col),
    # cast to bf16 fuses into the same copy.
    xp = jnp.pad(x_nhwc.astype(jnp.bfloat16),
                 ((0, 0), (1, 2 * Hg - H - 1), (1, 2 * Wg - W - 1), (0, 0)))
    xg = xp.reshape(B, Hg, 2, Wg, 2, Cin).transpose(0, 2, 4, 1, 3, 5)
    xg = xg.reshape(B, 4, L, Cin)
    xg = jnp.pad(xg, ((0, 0), (0, 0), (0, Lpad - L), (0, 0)))

    # tap (kh, kw) -> (parity grid index, flat offset inside that grid)
    taps = tuple(((i % 2) * 2 + (j % 2), (i // 2) * Wg + (j // 2))
                 for i in range(3) for j in range(3))
    apply_affine = blk["bn"] is not None
    kernel = _make_conv_kernel(taps, Lo, Cin, Cout, apply_affine,
                               use_mxu=(Cin >= 8))

    in_specs = [
        pl.BlockSpec((1, 4, Lpad, Cin), lambda b: (b, 0, 0, 0)),
        pl.BlockSpec((9, Cin, Cout), lambda b: (0, 0, 0)),
        pl.BlockSpec((1, Cout), lambda b: (0, 0)),
    ]
    inputs = [xg, blk["w_taps"], blk["bias"]]
    if apply_affine:
        in_specs += [pl.BlockSpec((1, Cout), lambda b: (0, 0)),
                     pl.BlockSpec((1, Cout), lambda b: (0, 0))]
        inputs += [blk["bn"][0], blk["bn"][1]]

    out = pl.pallas_call(
        kernel,
        out_shape=jax.ShapeDtypeStruct((B, Lo, Cout), jnp.float32),
        grid=(B,),
        in_specs=in_specs,
        out_specs=pl.BlockSpec((1, Lo, Cout), lambda b: (b, 0, 0)),
        compiler_params=pltpu.CompilerParams(
            dimension_semantics=("parallel",),
            vmem_limit_bytes=_VMEM_LIMIT),
    )(*inputs)
    # drop the junk column of the extended output
    return out.reshape(B, Ho, Wg, Cout)[:, :, :Wo, :]


# ----------------------------------------------------------------------------
# K-tiled linear head: Y = X @ W + b, grid over K tiles, f32 VMEM accumulator.
# N is pre-padded to 128 (lane-dense stores); column 0 is the real output.
# ----------------------------------------------------------------------------
def _linear_kernel(x_ref, w_ref, b_ref, o_ref, acc_ref):
    @pl.when(pl.program_id(0) == 0)
    def _():
        acc_ref[...] = jnp.zeros_like(acc_ref)

    acc_ref[...] += jnp.dot(x_ref[...], w_ref[...],
                            preferred_element_type=jnp.float32)

    @pl.when(pl.program_id(0) == pl.num_programs(0) - 1)
    def _():
        o_ref[...] = acc_ref[...] + b_ref[...]


def linear_lane_dense(x_bf16, w_bf16, b_f32, tk):
    M, Kp = x_bf16.shape
    N = w_bf16.shape[1]
    return pl.pallas_call(
        _linear_kernel,
        out_shape=jax.ShapeDtypeStruct((M, N), jnp.float32),
        grid=(Kp // tk,),
        in_specs=[pl.BlockSpec((M, tk), lambda k: (0, k)),
                  pl.BlockSpec((tk, N), lambda k: (k, 0)),
                  pl.BlockSpec((1, N), lambda k: (0, 0))],
        out_specs=pl.BlockSpec((M, N), lambda k: (0, 0)),
        scratch_shapes=[pltpu.VMEM((M, N), jnp.float32)],
        compiler_params=pltpu.CompilerParams(
            dimension_semantics=("arbitrary",),
            vmem_limit_bytes=_VMEM_LIMIT),
    )(x_bf16, w_bf16, b_f32)


# ----------------------------------------------------------------------------
# Discriminator2DFactory (norm_type='bn', reduction='sum'), eval mode.
# ----------------------------------------------------------------------------
def _conv_init(key, cin, cout, kh=3, kw=3):
    kw_key, kb_key = jax.random.split(key)
    fan_in = cin * kh * kw
    bound = 1.0 / np.sqrt(fan_in)
    w = jax.random.uniform(kw_key, (kh, kw, cin, cout), jnp.float32, -bound, bound)
    b = jax.random.uniform(kb_key, (cout,), jnp.float32, -bound, bound)
    return w, b


def init_disc2d_params(key, time_length, freq_length, c_in, hidden):
    k1, k2, k3, k4, kbn2, kbn3 = jax.random.split(key, 6)

    def pack(w_hwio, b, bn):
        cin, cout = int(w_hwio.shape[2]), int(w_hwio.shape[3])
        return {
            # weights pre-reshaped / pre-cast once (torch import: OIHW -> HWIO
            # permute would go here).
            "w_taps": w_hwio.reshape(9, cin, cout).astype(jnp.bfloat16),
            "bias": b.reshape(1, cout).astype(jnp.float32),
            "bn": bn,
            "cin": cin, "cout": cout,
        }

    blocks = []
    w, b = _conv_init(k1, c_in, hidden)          # block 1: first=True -> no BN
    blocks.append(pack(w, b, None))
    eps = 0.8                                    # nn.BatchNorm2d(h, 0.8) -> eps=0.8
    for kc, kbn in ((k2, kbn2), (k3, kbn3)):
        w, b = _conv_init(kc, hidden, hidden)
        kg, kb2 = jax.random.split(kbn)
        gamma = jax.random.uniform(kg, (hidden,), jnp.float32, 0.5, 1.5)
        beta = jax.random.uniform(kb2, (hidden,), jnp.float32, -0.1, 0.1)
        scale = (gamma / jnp.sqrt(1.0 + eps)).reshape(1, hidden).astype(jnp.float32)
        shift = beta.reshape(1, hidden).astype(jnp.float32)
        blocks.append(pack(w, b, (scale, shift)))

    # spatial dims after three stride-2 convs (matches torch ds_size for the
    # usual multiple-of-8 configs, robust otherwise).
    d0, d1 = time_length, freq_length
    for _ in range(3):
        d0, d1 = (d0 + 1) // 2, (d1 + 1) // 2
    feat = hidden * d0 * d1

    bound = 1.0 / np.sqrt(feat)
    k4w, k4b = jax.random.split(k4)
    adv_w_nchw = jax.random.uniform(k4w, (feat, 1), jnp.float32, -bound, bound)
    adv_b = jax.random.uniform(k4b, (1,), jnp.float32, -bound, bound)
    # Fold torch's NCHW-flatten order into the weight rows so the forward can
    # flatten the NHWC feature map directly (no activation transpose).
    perm = np.arange(feat).reshape(hidden, d0, d1).transpose(1, 2, 0).reshape(-1)
    adv_w = adv_w_nchw[perm]
    Kp = _round_up(feat, 512) if feat > 512 else _round_up(feat, 128)
    TK = min(Kp, 512)
    adv_w = jnp.pad(adv_w, ((0, Kp - feat), (0, 0)))                 # (Kp, 1)
    adv_w = jnp.pad(adv_w, ((0, 0), (0, 127))).astype(jnp.bfloat16)  # (Kp, 128)
    adv_b = jnp.pad(adv_b.reshape(1, 1), ((0, 0), (0, 127))).astype(jnp.float32)
    return {"blocks": blocks, "adv_w": adv_w, "adv_b": adv_b,
            "adv_Kp": Kp, "adv_TK": TK, "adv_feat": feat}


def disc2d_forward(params, x_nchw):
    """x: (B, c_in, T, n_bins) -> (validity (B, 1), h: list of NCHW hiddens)."""
    x = jnp.transpose(x_nchw, (0, 2, 3, 1))      # NCHW -> NHWC compute layout
    h = []
    for blk in params["blocks"]:
        x = conv_block_s2(x, blk)
        # NCHW hiddens are output packaging only (module contract); the next
        # block keeps consuming the NHWC tensor, so this is off the hot path.
        h.append(jnp.transpose(x, (0, 3, 1, 2)))
    B = x.shape[0]
    flat = x.reshape(B, -1)                      # NHWC flatten; adv_w pre-permuted
    assert flat.shape[1] == params["adv_feat"]
    flat = jnp.pad(flat, ((0, 0), (0, params["adv_Kp"] - params["adv_feat"])))
    validity = linear_lane_dense(flat.astype(jnp.bfloat16),
                                 params["adv_w"], params["adv_b"],
                                 params["adv_TK"])
    return validity[:, :1], h


# ----------------------------------------------------------------------------
# MultiWindowDiscriminator (cond_size=0)
# ----------------------------------------------------------------------------
class MultiWindowDiscriminatorPallas:
    def __init__(self, key, time_lengths, freq_length=80, c_in=1,
                 hidden_size=128, reduction="sum"):
        self.win_lengths = list(time_lengths)
        self.reduction = reduction
        keys = jax.random.split(key, len(self.win_lengths))
        self.discs = [init_disc2d_params(k, tl, freq_length, c_in, hidden_size)
                      for k, tl in zip(keys, self.win_lengths)]
        # One jitted forward per window: the three conv blocks + adv head (and
        # all glue ops) compile into a single XLA program per window size.
        self._fwds = [jax.jit(functools.partial(disc2d_forward, p))
                      for p in self.discs]

    def clip(self, x, x_len, win_length, start_frames=None):
        T_end = int(np.max(np.asarray(x_len))) - win_length
        if T_end < 0:
            return None, start_frames
        if start_frames is None:
            start_frame = int(np.random.randint(low=0, high=T_end + 1))
            start_frames = [start_frame] * x.shape[0]
        else:
            start_frame = start_frames[0]
        x_batch = x[:, :, start_frame:start_frame + win_length]
        return x_batch, start_frames

    def __call__(self, x, x_len, start_frames_wins=None):
        validity = []
        if start_frames_wins is None:
            start_frames_wins = [None] * len(self.discs)
        h = []
        for i, start_frames in enumerate(start_frames_wins):
            x_clip, start_frames = self.clip(x, x_len, self.win_lengths[i],
                                             start_frames)
            start_frames_wins[i] = start_frames
            if x_clip is None:
                continue
            v, h_ = self._fwds[i](x_clip)
            h += list(h_)
            validity.append(v)
        if len(validity) != len(self.discs):
            return None, start_frames_wins, h
        if self.reduction == "sum":
            validity = sum(validity)
        elif self.reduction == "stack":
            validity = jnp.stack(validity, -1)
        elif self.reduction == "none":
            validity = jnp.concatenate(validity, -1)
        return validity, start_frames_wins, h


if __name__ == "__main__":
    key = jax.random.PRNGKey(0)
    k_x, k_p = jax.random.split(key)

    B, C_IN, T, N_BINS = 2, 1, 32, 16
    HIDDEN = 32
    TIME_LENGTHS = (8, 16)

    x = jax.random.normal(k_x, (B, C_IN, T, N_BINS), jnp.float32)
    x_len = np.array([T, T - 8], dtype=np.int32)

    disc = MultiWindowDiscriminatorPallas(
        k_p, TIME_LENGTHS, freq_length=N_BINS, c_in=C_IN,
        hidden_size=HIDDEN, reduction="sum")

    # deterministic clip starts (module allows passing start_frames_wins)
    start_frames_wins = [[1] * B, [3] * B]

    validity, sfw, h = disc(x, x_len, start_frames_wins)
    validity = jax.block_until_ready(validity)
    h = jax.block_until_ready(h)

    assert validity.shape == (B, 1), validity.shape
    assert len(h) == 3 * len(TIME_LENGTHS)
    assert h[0].shape == (B, HIDDEN, 4, 8), h[0].shape   # NCHW hidden of block 1
    assert bool(jnp.all(jnp.isfinite(validity)))
    print("KERNEL_OK")
</pallas_src>

<mosaic_0001>
module attributes {stable_mosaic.version = 11 : i64} {
  func.func @kernel(%arg0: i32, %arg1: memref<1x4x54x1xbf16, #tpu.memory_space<vmem>>, %arg2: memref<9x1x32xbf16, #tpu.memory_space<vmem>>, %arg3: memref<1x32xf32, #tpu.memory_space<vmem>>, %arg4: memref<1x36x32xf32, #tpu.memory_space<vmem>>) attributes {dimension_semantics = [#tpu.dimension_semantics<parallel>], iteration_bounds = array<i64: 2>, scalar_prefetch = 0 : i64, scratch_operands = 0 : i64, tpu.core_type = #tpu.core_type<tc>, window_params = [{transform_indices = @transform_0, window_bounds = array<i64: 1, 4, 54, 1>}, {pipeline_mode = #tpu.pipeline_mode<synchronous>, transform_indices = @transform_1, window_bounds = array<i64: 9, 1, 32>}, {pipeline_mode = #tpu.pipeline_mode<synchronous>, transform_indices = @transform_2, window_bounds = array<i64: 1, 32>}, {transform_indices = @transform_3, window_bounds = array<i64: 1, 36, 32>}]} {
    %cst = arith.constant 0.000000e+00 : f32
    %0 = vector.broadcast %cst : f32 to vector<36x32xf32>
    %c0 = arith.constant 0 : index
    %c0_0 = arith.constant 0 : index
    %c0_1 = arith.constant 0 : index
    %c0_2 = arith.constant 0 : index
    %1 = vector.load %arg1[%c0, %c0_0, %c0_1, %c0_2] : memref<1x4x54x1xbf16, #tpu.memory_space<vmem>>, vector<1x1x36x1xbf16>
    %2 = vector.shape_cast %1 : vector<1x1x36x1xbf16> to vector<36x1xbf16>
    %3 = arith.extf %2 : vector<36x1xbf16> to vector<36x1xf32>
    %c0_3 = arith.constant 0 : index
    %c0_4 = arith.constant 0 : index
    %c0_5 = arith.constant 0 : index
    %4 = vector.load %arg2[%c0_3, %c0_4, %c0_5] : memref<9x1x32xbf16, #tpu.memory_space<vmem>>, vector<1x1x32xbf16>
    %5 = vector.shape_cast %4 : vector<1x1x32xbf16> to vector<1x32xbf16>
    %6 = arith.extf %5 : vector<1x32xbf16> to vector<1x32xf32>
    %7 = vector.broadcast %3 : vector<36x1xf32> to vector<36x32xf32>
    %8 = vector.broadcast %6 : vector<1x32xf32> to vector<36x32xf32>
    %9 = arith.mulf %7, %8 : vector<36x32xf32>
    %10 = arith.addf %0, %9 : vector<36x32xf32>
    %c0_6 = arith.constant 0 : index
    %c1 = arith.constant 1 : index
    %c0_7 = arith.constant 0 : index
    %c0_8 = arith.constant 0 : index
    %11 = vector.load %arg1[%c0_6, %c1, %c0_7, %c0_8] : memref<1x4x54x1xbf16, #tpu.memory_space<vmem>>, vector<1x1x36x1xbf16>
    %12 = vector.shape_cast %11 : vector<1x1x36x1xbf16> to vector<36x1xbf16>
    %13 = arith.extf %12 : vector<36x1xbf16> to vector<36x1xf32>
    %c1_9 = arith.constant 1 : index
    %c0_10 = arith.constant 0 : index
    %c0_11 = arith.constant 0 : index
    %14 = vector.load %arg2[%c1_9, %c0_10, %c0_11] : memref<9x1x32xbf16, #tpu.memory_space<vmem>>, vector<1x1x32xbf16>
    %15 = vector.shape_cast %14 : vector<1x1x32xbf16> to vector<1x32xbf16>
    %16 = arith.extf %15 : vector<1x32xbf16> to vector<1x32xf32>
    %17 = vector.broadcast %13 : vector<36x1xf32> to vector<36x32xf32>
    %18 = vector.broadcast %16 : vector<1x32xf32> to vector<36x32xf32>
    %19 = arith.mulf %17, %18 : vector<36x32xf32>
    %20 = arith.addf %10, %19 : vector<36x32xf32>
    %c0_12 = arith.constant 0 : index
    %c0_13 = arith.constant 0 : index
    %c1_14 = arith.constant 1 : index
    %c0_15 = arith.constant 0 : index
    %21 = vector.load %arg1[%c0_12, %c0_13, %c1_14, %c0_15] : memref<1x4x54x1xbf16, #tpu.memory_space<vmem>>, vector<1x1x36x1xbf16>
    %22 = vector.shape_cast %21 : vector<1x1x36x1xbf16> to vector<36x1xbf16>
    %23 = arith.extf %22 : vector<36x1xbf16> to vector<36x1xf32>
    %c2 = arith.constant 2 : index
    %c0_16 = arith.constant 0 : index
    %c0_17 = arith.constant 0 : index
    %24 = vector.load %arg2[%c2, %c0_16, %c0_17] : memref<9x1x32xbf16, #tpu.memory_space<vmem>>, vector<1x1x32xbf16>
    %25 = vector.shape_cast %24 : vector<1x1x32xbf16> to vector<1x32xbf16>
    %26 = arith.extf %25 : vector<1x32xbf16> to vector<1x32xf32>
    %27 = vector.broadcast %23 : vector<36x1xf32> to vector<36x32xf32>
    %28 = vector.broadcast %26 : vector<1x32xf32> to vector<36x32xf32>
    %29 = arith.mulf %27, %28 : vector<36x32xf32>
    %30 = arith.addf %20, %29 : vector<36x32xf32>
    %c0_18 = arith.constant 0 : index
    %c2_19 = arith.constant 2 : index
    %c0_20 = arith.constant 0 : index
    %c0_21 = arith.constant 0 : index
    %31 = vector.load %arg1[%c0_18, %c2_19, %c0_20, %c0_21] : memref<1x4x54x1xbf16, #tpu.memory_space<vmem>>, vector<1x1x36x1xbf16>
    %32 = vector.shape_cast %31 : vector<1x1x36x1xbf16> to vector<36x1xbf16>
    %33 = arith.extf %32 : vector<36x1xbf16> to vector<36x1xf32>
    %c3 = arith.constant 3 : index
    %c0_22 = arith.constant 0 : index
    %c0_23 = arith.constant 0 : index
    %34 = vector.load %arg2[%c3, %c0_22, %c0_23] : memref<9x1x32xbf16, #tpu.memory_space<vmem>>, vector<1x1x32xbf16>
    %35 = vector.shape_cast %34 : vector<1x1x32xbf16> to vector<1x32xbf16>
    %36 = arith.extf %35 : vector<1x32xbf16> to vector<1x32xf32>
    %37 = vector.broadcast %33 : vector<36x1xf32> to vector<36x32xf32>
    %38 = vector.broadcast %36 : vector<1x32xf32> to vector<36x32xf32>
    %39 = arith.mulf %37, %38 : vector<36x32xf32>
    %40 = arith.addf %30, %39 : vector<36x32xf32>
    %c0_24 = arith.constant 0 : index
    %c3_25 = arith.constant 3 : index
    %c0_26 = arith.constant 0 : index
    %c0_27 = arith.constant 0 : index
    %41 = vector.load %arg1[%c0_24, %c3_25, %c0_26, %c0_27] : memref<1x4x54x1xbf16, #tpu.memory_space<vmem>>, vector<1x1x36x1xbf16>
    %42 = vector.shape_cast %41 : vector<1x1x36x1xbf16> to vector<36x1xbf16>
    %43 = arith.extf %42 : vector<36x1xbf16> to vector<36x1xf32>
    %c4 = arith.constant 4 : index
    %c0_28 = arith.constant 0 : index
    %c0_29 = arith.constant 0 : index
    %44 = vector.load %arg2[%c4, %c0_28, %c0_29] : memref<9x1x32xbf16, #tpu.memory_space<vmem>>, vector<1x1x32xbf16>
    %45 = vector.shape_cast %44 : vector<1x1x32xbf16> to vector<1x32xbf16>
    %46 = arith.extf %45 : vector<1x32xbf16> to vector<1x32xf32>
    %47 = vector.broadcast %43 : vector<36x1xf32> to vector<36x32xf32>
    %48 = vector.broadcast %46 : vector<1x32xf32> to vector<36x32xf32>
    %49 = arith.mulf %47, %48 : vector<36x32xf32>
    %50 = arith.addf %40, %49 : vector<36x32xf32>
    %c0_30 = arith.constant 0 : index
    %c2_31 = arith.constant 2 : index
    %c1_32 = arith.constant 1 : index
    %c0_33 = arith.constant 0 : index
    %51 = vector.load %arg1[%c0_30, %c2_31, %c1_32, %c0_33] : memref<1x4x54x1xbf16, #tpu.memory_space<vmem>>, vector<1x1x36x1xbf16>
    %52 = vector.shape_cast %51 : vector<1x1x36x1xbf16> to vector<36x1xbf16>
    %53 = arith.extf %52 : vector<36x1xbf16> to vector<36x1xf32>
    %c5 = arith.constant 5 : index
    %c0_34 = arith.constant 0 : index
    %c0_35 = arith.constant 0 : index
    %54 = vector.load %arg2[%c5, %c0_34, %c0_35] : memref<9x1x32xbf16, #tpu.memory_space<vmem>>, vector<1x1x32xbf16>
    %55 = vector.shape_cast %54 : vector<1x1x32xbf16> to vector<1x32xbf16>
    %56 = arith.extf %55 : vector<1x32xbf16> to vector<1x32xf32>
    %57 = vector.broadcast %53 : vector<36x1xf32> to vector<36x32xf32>
    %58 = vector.broadcast %56 : vector<1x32xf32> to vector<36x32xf32>
    %59 = arith.mulf %57, %58 : vector<36x32xf32>
    %60 = arith.addf %50, %59 : vector<36x32xf32>
    %c0_36 = arith.constant 0 : index
    %c0_37 = arith.constant 0 : index
    %c9 = arith.constant 9 : index
    %c0_38 = arith.constant 0 : index
    %61 = vector.load %arg1[%c0_36, %c0_37, %c9, %c0_38] : memref<1x4x54x1xbf16, #tpu.memory_space<vmem>>, vector<1x1x36x1xbf16>
    %62 = vector.shape_cast %61 : vector<1x1x36x1xbf16> to vector<36x1xbf16>
    %63 = arith.extf %62 : vector<36x1xbf16> to vector<36x1xf32>
    %c6 = arith.constant 6 : index
    %c0_39 = arith.constant 0 : index
    %c0_40 = arith.constant 0 : index
    %64 = vector.load %arg2[%c6, %c0_39, %c0_40] : memref<9x1x32xbf16, #tpu.memory_space<vmem>>, vector<1x1x32xbf16>
    %65 = vector.shape_cast %64 : vector<1x1x32xbf16> to vector<1x32xbf16>
    %66 = arith.extf %65 : vector<1x32xbf16> to vector<1x32xf32>
    %67 = vector.broadcast %63 : vector<36x1xf32> to vector<36x32xf32>
    %68 = vector.broadcast %66 : vector<1x32xf32> to vector<36x32xf32>
    %69 = arith.mulf %67, %68 : vector<36x32xf32>
    %70 = arith.addf %60, %69 : vector<36x32xf32>
    %c0_41 = arith.constant 0 : index
    %c1_42 = arith.constant 1 : index
    %c9_43 = arith.constant 9 : index
    %c0_44 = arith.constant 0 : index
    %71 = vector.load %arg1[%c0_41, %c1_42, %c9_43, %c0_44] : memref<1x4x54x1xbf16, #tpu.memory_space<vmem>>, vector<1x1x36x1xbf16>
    %72 = vector.shape_cast %71 : vector<1x1x36x1xbf16> to vector<36x1xbf16>
    %73 = arith.extf %72 : vector<36x1xbf16> to vector<36x1xf32>
    %c7 = arith.constant 7 : index
    %c0_45 = arith.constant 0 : index
    %c0_46 = arith.constant 0 : index
    %74 = vector.load %arg2[%c7, %c0_45, %c0_46] : memref<9x1x32xbf16, #tpu.memory_space<vmem>>, vector<1x1x32xbf16>
    %75 = vector.shape_cast %74 : vector<1x1x32xbf16> to vector<1x32xbf16>
    %76 = arith.extf %75 : vector<1x32xbf16> to vector<1x32xf32>
    %77 = vector.broadcast %73 : vector<36x1xf32> to vector<36x32xf32>
    %78 = vector.broadcast %76 : vector<1x32xf32> to vector<36x32xf32>
    %79 = arith.mulf %77, %78 : vector<36x32xf32>
    %80 = arith.addf %70, %79 : vector<36x32xf32>
    %c0_47 = arith.constant 0 : index
    %c0_48 = arith.constant 0 : index
    %c10 = arith.constant 10 : index
    %c0_49 = arith.constant 0 : index
    %81 = vector.load %arg1[%c0_47, %c0_48, %c10, %c0_49] : memref<1x4x54x1xbf16, #tpu.memory_space<vmem>>, vector<1x1x36x1xbf16>
    %82 = vector.shape_cast %81 : vector<1x1x36x1xbf16> to vector<36x1xbf16>
    %83 = arith.extf %82 : vector<36x1xbf16> to vector<36x1xf32>
    %c8 = arith.constant 8 : index
    %c0_50 = arith.constant 0 : index
    %c0_51 = arith.constant 0 : index
    %84 = vector.load %arg2[%c8, %c0_50, %c0_51] : memref<9x1x32xbf16, #tpu.memory_space<vmem>>, vector<1x1x32xbf16>
    %85 = vector.shape_cast %84 : vector<1x1x32xbf16> to vector<1x32xbf16>
    %86 = arith.extf %85 : vector<1x32xbf16> to vector<1x32xf32>
    %87 = vector.broadcast %83 : vector<36x1xf32> to vector<36x32xf32>
    %88 = vector.broadcast %86 : vector<1x32xf32> to vector<36x32xf32>
    %89 = arith.mulf %87, %88 : vector<36x32xf32>
    %90 = arith.addf %80, %89 : vector<36x32xf32>
    %c0_52 = arith.constant 0 : index
    %c0_53 = arith.constant 0 : index
    %91 = vector.load %arg3[%c0_52, %c0_53] : memref<1x32xf32, #tpu.memory_space<vmem>>, vector<1x32xf32>
    %92 = vector.broadcast %91 : vector<1x32xf32> to vector<36x32xf32>
    %93 = arith.addf %90, %92 : vector<36x32xf32>
    %cst_54 = arith.constant 0.000000e+00 : f32
    %94 = vector.broadcast %cst_54 : f32 to vector<36x32xf32>
    %95 = arith.cmpf ogt, %93, %94 : vector<36x32xf32>
    %cst_55 = arith.constant 2.000000e-01 : f32
    %96 = vector.broadcast %cst_55 : f32 to vector<36x32xf32>
    %97 = arith.mulf %96, %93 : vector<36x32xf32>
    %98 = arith.select %95, %93, %97 : vector<36x32xi1>, vector<36x32xf32>
    %c0_56 = arith.constant 0 : index
    %c0_57 = arith.constant 0 : index
    %c0_58 = arith.constant 0 : index
    %99 = vector.load %arg4[%c0_56, %c0_57, %c0_58] : memref<1x36x32xf32, #tpu.memory_space<vmem>>, vector<1x36x32xf32>
    %100 = vector.shape_cast %99 : vector<1x36x32xf32> to vector<36x32xf32>
    %101 = vector.shape_cast %98 : vector<36x32xf32> to vector<1x36x32xf32>
    tpu.vector_store %arg4[%c0_56, %c0_57, %c0_58], %101 {strides = array<i32>} : memref<1x36x32xf32, #tpu.memory_space<vmem>>, vector<1x36x32xf32>,
    return
  }
  func.func @transform_0(%arg0: i32) -> (i32, i32, i32, i32) {
    %c0_i32 = arith.constant 0 : i32
    %c0_i32_0 = arith.constant 0 : i32
    %c0_i32_1 = arith.constant 0 : i32
    %c0_i32_2 = arith.constant 0 : i32
    return %arg0, %c0_i32, %c0_i32_0, %c0_i32_1 : i32, i32, i32, i32
  }
  func.func @transform_1(%arg0: i32) -> (i32, i32, i32) {
    %c0_i32 = arith.constant 0 : i32
    %c0_i32_0 = arith.constant 0 : i32
    %c0_i32_1 = arith.constant 0 : i32
    %c0_i32_2 = arith.constant 0 : i32
    return %c0_i32, %c0_i32_0, %c0_i32_1 : i32, i32, i32
  }
  func.func @transform_2(%arg0: i32) -> (i32, i32) {
    %c0_i32 = arith.constant 0 : i32
    %c0_i32_0 = arith.constant 0 : i32
    %c0_i32_1 = arith.constant 0 : i32
    return %c0_i32, %c0_i32_0 : i32, i32
  }
  func.func @transform_3(%arg0: i32) -> (i32, i32, i32) {
    %c0_i32 = arith.constant 0 : i32
    %c0_i32_0 = arith.constant 0 : i32
    %c0_i32_1 = arith.constant 0 : i32
    return %arg0, %c0_i32, %c0_i32_0 : i32, i32, i32
  }
}

module attributes {stable_mosaic.version = 11 : i64} {
  func.func @kernel(%arg0: i32, %arg1: memref<1x4x20x32xbf16, #tpu.memory_space<vmem>>, %arg2: memref<9x32x32xbf16, #tpu.memory_space<vmem>>, %arg3: memref<1x32xf32, #tpu.memory_space<vmem>>, %arg4: memref<1x32xf32, #tpu.memory_space<vmem>>, %arg5: memref<1x32xf32, #tpu.memory_space<vmem>>, %arg6: memref<1x10x32xf32, #tpu.memory_space<vmem>>) attributes {dimension_semantics = [#tpu.dimension_semantics<parallel>], iteration_bounds = array<i64: 2>, scalar_prefetch = 0 : i64, scratch_operands = 0 : i64, tpu.core_type = #tpu.core_type<tc>, window_params = [{transform_indices = @transform_0, window_bounds = array<i64: 1, 4, 20, 32>}, {pipeline_mode = #tpu.pipeline_mode<synchronous>, transform_indices = @transform_1, window_bounds = array<i64: 9, 32, 32>}, {pipeline_mode = #tpu.pipeline_mode<synchronous>, transform_indices = @transform_2, window_bounds = array<i64: 1, 32>}, {pipeline_mode = #tpu.pipeline_mode<synchronous>, transform_indices = @transform_3, window_bounds = array<i64: 1, 32>}, {pipeline_mode = #tpu.pipeline_mode<synchronous>, transform_indices = @transform_4, window_bounds = array<i64: 1, 32>}, {transform_indices = @transform_5, window_bounds = array<i64: 1, 10, 32>}]} {
    %cst = arith.constant 0.000000e+00 : f32
    %0 = vector.broadcast %cst : f32 to vector<10x32xf32>
    %c0 = arith.constant 0 : index
    %c0_0 = arith.constant 0 : index
    %c0_1 = arith.constant 0 : index
    %c0_2 = arith.constant 0 : index
    %1 = vector.load %arg1[%c0, %c0_0, %c0_1, %c0_2] : memref<1x4x20x32xbf16, #tpu.memory_space<vmem>>, vector<1x1x10x32xbf16>
    %2 = vector.shape_cast %1 : vector<1x1x10x32xbf16> to vector<10x32xbf16>
    %c0_3 = arith.constant 0 : index
    %c0_4 = arith.constant 0 : index
    %c0_5 = arith.constant 0 : index
    %3 = vector.load %arg2[%c0_3, %c0_4, %c0_5] : memref<9x32x32xbf16, #tpu.memory_space<vmem>>, vector<1x32x32xbf16>
    %4 = vector.shape_cast %3 : vector<1x32x32xbf16> to vector<32x32xbf16>
    %cst_6 = arith.constant dense<0.000000e+00> : vector<10x32xf32>
    %5 = tpu.matmul %2, %4, %cst_6 {dimension_numbers = #tpu.dot_dimension_numbers<[1], [0], [0], [1], [0, 0, 1, 1], [], []>} : vector<10x32xbf16>, vector<32x32xbf16>, vector<10x32xf32> -> vector<10x32xf32>
    %6 = arith.addf %0, %5 : vector<10x32xf32>
    %c0_7 = arith.constant 0 : index
    %c1 = arith.constant 1 : index
    %c0_8 = arith.constant 0 : index
    %c0_9 = arith.constant 0 : index
    %7 = vector.load %arg1[%c0_7, %c1, %c0_8, %c0_9] : memref<1x4x20x32xbf16, #tpu.memory_space<vmem>>, vector<1x1x10x32xbf16>
    %8 = vector.shape_cast %7 : vector<1x1x10x32xbf16> to vector<10x32xbf16>
    %c1_10 = arith.constant 1 : index
    %c0_11 = arith.constant 0 : index
    %c0_12 = arith.constant 0 : index
    %9 = vector.load %arg2[%c1_10, %c0_11, %c0_12] : memref<9x32x32xbf16, #tpu.memory_space<vmem>>, vector<1x32x32xbf16>
    %10 = vector.shape_cast %9 : vector<1x32x32xbf16> to vector<32x32xbf16>
    %cst_13 = arith.constant dense<0.000000e+00> : vector<10x32xf32>
    %11 = tpu.matmul %8, %10, %cst_13 {dimension_numbers = #tpu.dot_dimension_numbers<[1], [0], [0], [1], [0, 0, 1, 1], [], []>} : vector<10x32xbf16>, vector<32x32xbf16>, vector<10x32xf32> -> vector<10x32xf32>
    %12 = arith.addf %6, %11 : vector<10x32xf32>
    %c0_14 = arith.constant 0 : index
    %c0_15 = arith.constant 0 : index
    %c1_16 = arith.constant 1 : index
    %c0_17 = arith.constant 0 : index
    %13 = vector.load %arg1[%c0_14, %c0_15, %c1_16, %c0_17] : memref<1x4x20x32xbf16, #tpu.memory_space<vmem>>, vector<1x1x10x32xbf16>
    %14 = vector.shape_cast %13 : vector<1x1x10x32xbf16> to vector<10x32xbf16>
    %c2 = arith.constant 2 : index
    %c0_18 = arith.constant 0 : index
    %c0_19 = arith.constant 0 : index
    %15 = vector.load %arg2[%c2, %c0_18, %c0_19] : memref<9x32x32xbf16, #tpu.memory_space<vmem>>, vector<1x32x32xbf16>
    %16 = vector.shape_cast %15 : vector<1x32x32xbf16> to vector<32x32xbf16>
    %cst_20 = arith.constant dense<0.000000e+00> : vector<10x32xf32>
    %17 = tpu.matmul %14, %16, %cst_20 {dimension_numbers = #tpu.dot_dimension_numbers<[1], [0], [0], [1], [0, 0, 1, 1], [], []>} : vector<10x32xbf16>, vector<32x32xbf16>, vector<10x32xf32> -> vector<10x32xf32>
    %18 = arith.addf %12, %17 : vector<10x32xf32>
    %c0_21 = arith.constant 0 : index
    %c2_22 = arith.constant 2 : index
    %c0_23 = arith.constant 0 : index
    %c0_24 = arith.constant 0 : index
    %19 = vector.load %arg1[%c0_21, %c2_22, %c0_23, %c0_24] : memref<1x4x20x32xbf16, #tpu.memory_space<vmem>>, vector<1x1x10x32xbf16>
    %20 = vector.shape_cast %19 : vector<1x1x10x32xbf16> to vector<10x32xbf16>
    %c3 = arith.constant 3 : index
    %c0_25 = arith.constant 0 : index
    %c0_26 = arith.constant 0 : index
    %21 = vector.load %arg2[%c3, %c0_25, %c0_26] : memref<9x32x32xbf16, #tpu.memory_space<vmem>>, vector<1x32x32xbf16>
    %22 = vector.shape_cast %21 : vector<1x32x32xbf16> to vector<32x32xbf16>
    %cst_27 = arith.constant dense<0.000000e+00> : vector<10x32xf32>
    %23 = tpu.matmul %20, %22, %cst_27 {dimension_numbers = #tpu.dot_dimension_numbers<[1], [0], [0], [1], [0, 0, 1, 1], [], []>} : vector<10x32xbf16>, vector<32x32xbf16>, vector<10x32xf32> -> vector<10x32xf32>
    %24 = arith.addf %18, %23 : vector<10x32xf32>
    %c0_28 = arith.constant 0 : index
    %c3_29 = arith.constant 3 : index
    %c0_30 = arith.constant 0 : index
    %c0_31 = arith.constant 0 : index
    %25 = vector.load %arg1[%c0_28, %c3_29, %c0_30, %c0_31] : memref<1x4x20x32xbf16, #tpu.memory_space<vmem>>, vector<1x1x10x32xbf16>
    %26 = vector.shape_cast %25 : vector<1x1x10x32xbf16> to vector<10x32xbf16>
    %c4 = arith.constant 4 : index
    %c0_32 = arith.constant 0 : index
    %c0_33 = arith.constant 0 : index
    %27 = vector.load %arg2[%c4, %c0_32, %c0_33] : memref<9x32x32xbf16, #tpu.memory_space<vmem>>, vector<1x32x32xbf16>
    %28 = vector.shape_cast %27 : vector<1x32x32xbf16> to vector<32x32xbf16>
    %cst_34 = arith.constant dense<0.000000e+00> : vector<10x32xf32>
    %29 = tpu.matmul %26, %28, %cst_34 {dimension_numbers = #tpu.dot_dimension_numbers<[1], [0], [0], [1], [0, 0, 1, 1], [], []>} : vector<10x32xbf16>, vector<32x32xbf16>, vector<10x32xf32> -> vector<10x32xf32>
    %30 = arith.addf %24, %29 : vector<10x32xf32>
    %c0_35 = arith.constant 0 : index
    %c2_36 = arith.constant 2 : index
    %c1_37 = arith.constant 1 : index
    %c0_38 = arith.constant 0 : index
    %31 = vector.load %arg1[%c0_35, %c2_36, %c1_37, %c0_38] : memref<1x4x20x32xbf16, #tpu.memory_space<vmem>>, vector<1x1x10x32xbf16>
    %32 = vector.shape_cast %31 : vector<1x1x10x32xbf16> to vector<10x32xbf16>
    %c5 = arith.constant 5 : index
    %c0_39 = arith.constant 0 : index
    %c0_40 = arith.constant 0 : index
    %33 = vector.load %arg2[%c5, %c0_39, %c0_40] : memref<9x32x32xbf16, #tpu.memory_space<vmem>>, vector<1x32x32xbf16>
    %34 = vector.shape_cast %33 : vector<1x32x32xbf16> to vector<32x32xbf16>
    %cst_41 = arith.constant dense<0.000000e+00> : vector<10x32xf32>
    %35 = tpu.matmul %32, %34, %cst_41 {dimension_numbers = #tpu.dot_dimension_numbers<[1], [0], [0], [1], [0, 0, 1, 1], [], []>} : vector<10x32xbf16>, vector<32x32xbf16>, vector<10x32xf32> -> vector<10x32xf32>
    %36 = arith.addf %30, %35 : vector<10x32xf32>
    %c0_42 = arith.constant 0 : index
    %c0_43 = arith.constant 0 : index
    %c5_44 = arith.constant 5 : index
    %c0_45 = arith.constant 0 : index
    %37 = vector.load %arg1[%c0_42, %c0_43, %c5_44, %c0_45] : memref<1x4x20x32xbf16, #tpu.memory_space<vmem>>, vector<1x1x10x32xbf16>
    %38 = vector.shape_cast %37 : vector<1x1x10x32xbf16> to vector<10x32xbf16>
    %c6 = arith.constant 6 : index
    %c0_46 = arith.constant 0 : index
    %c0_47 = arith.constant 0 : index
    %39 = vector.load %arg2[%c6, %c0_46, %c0_47] : memref<9x32x32xbf16, #tpu.memory_space<vmem>>, vector<1x32x32xbf16>
    %40 = vector.shape_cast %39 : vector<1x32x32xbf16> to vector<32x32xbf16>
    %cst_48 = arith.constant dense<0.000000e+00> : vector<10x32xf32>
    %41 = tpu.matmul %38, %40, %cst_48 {dimension_numbers = #tpu.dot_dimension_numbers<[1], [0], [0], [1], [0, 0, 1, 1], [], []>} : vector<10x32xbf16>, vector<32x32xbf16>, vector<10x32xf32> -> vector<10x32xf32>
    %42 = arith.addf %36, %41 : vector<10x32xf32>
    %c0_49 = arith.constant 0 : index
    %c1_50 = arith.constant 1 : index
    %c5_51 = arith.constant 5 : index
    %c0_52 = arith.constant 0 : index
    %43 = vector.load %arg1[%c0_49, %c1_50, %c5_51, %c0_52] : memref<1x4x20x32xbf16, #tpu.memory_space<vmem>>, vector<1x1x10x32xbf16>
    %44 = vector.shape_cast %43 : vector<1x1x10x32xbf16> to vector<10x32xbf16>
    %c7 = arith.constant 7 : index
    %c0_53 = arith.constant 0 : index
    %c0_54 = arith.constant 0 : index
    %45 = vector.load %arg2[%c7, %c0_53, %c0_54] : memref<9x32x32xbf16, #tpu.memory_space<vmem>>, vector<1x32x32xbf16>
    %46 = vector.shape_cast %45 : vector<1x32x32xbf16> to vector<32x32xbf16>
    %cst_55 = arith.constant dense<0.000000e+00> : vector<10x32xf32>
    %47 = tpu.matmul %44, %46, %cst_55 {dimension_numbers = #tpu.dot_dimension_numbers<[1], [0], [0], [1], [0, 0, 1, 1], [], []>} : vector<10x32xbf16>, vector<32x32xbf16>, vector<10x32xf32> -> vector<10x32xf32>
    %48 = arith.addf %42, %47 : vector<10x32xf32>
    %c0_56 = arith.constant 0 : index
    %c0_57 = arith.constant 0 : index
    %c6_58 = arith.constant 6 : index
    %c0_59 = arith.constant 0 : index
    %49 = vector.load %arg1[%c0_56, %c0_57, %c6_58, %c0_59] : memref<1x4x20x32xbf16, #tpu.memory_space<vmem>>, vector<1x1x10x32xbf16>
    %50 = vector.shape_cast %49 : vector<1x1x10x32xbf16> to vector<10x32xbf16>
    %c8 = arith.constant 8 : index
    %c0_60 = arith.constant 0 : index
    %c0_61 = arith.constant 0 : index
    %51 = vector.load %arg2[%c8, %c0_60, %c0_61] : memref<9x32x32xbf16, #tpu.memory_space<vmem>>, vector<1x32x32xbf16>
    %52 = vector.shape_cast %51 : vector<1x32x32xbf16> to vector<32x32xbf16>
    %cst_62 = arith.constant dense<0.000000e+00> : vector<10x32xf32>
    %53 = tpu.matmul %50, %52, %cst_62 {dimension_numbers = #tpu.dot_dimension_numbers<[1], [0], [0], [1], [0, 0, 1, 1], [], []>} : vector<10x32xbf16>, vector<32x32xbf16>, vector<10x32xf32> -> vector<10x32xf32>
    %54 = arith.addf %48, %53 : vector<10x32xf32>
    %c0_63 = arith.constant 0 : index
    %c0_64 = arith.constant 0 : index
    %55 = vector.load %arg3[%c0_63, %c0_64] : memref<1x32xf32, #tpu.memory_space<vmem>>, vector<1x32xf32>
    %56 = vector.broadcast %55 : vector<1x32xf32> to vector<10x32xf32>
    %57 = arith.addf %54, %56 : vector<10x32xf32>
    %cst_65 = arith.constant 0.000000e+00 : f32
    %58 = vector.broadcast %cst_65 : f32 to vector<10x32xf32>
    %59 = arith.cmpf ogt, %57, %58 : vector<10x32xf32>
    %cst_66 = arith.constant 2.000000e-01 : f32
    %60 = vector.broadcast %cst_66 : f32 to vector<10x32xf32>
    %61 = arith.mulf %60, %57 : vector<10x32xf32>
    %62 = arith.select %59, %57, %61 : vector<10x32xi1>, vector<10x32xf32>
    %c0_67 = arith.constant 0 : index
    %c0_68 = arith.constant 0 : index
    %63 = vector.load %arg4[%c0_67, %c0_68] : memref<1x32xf32, #tpu.memory_space<vmem>>, vector<1x32xf32>
    %64 = vector.broadcast %63 : vector<1x32xf32> to vector<10x32xf32>
    %65 = arith.mulf %62, %64 : vector<10x32xf32>
    %c0_69 = arith.constant 0 : index
    %c0_70 = arith.constant 0 : index
    %66 = vector.load %arg5[%c0_69, %c0_70] : memref<1x32xf32, #tpu.memory_space<vmem>>, vector<1x32xf32>
    %67 = vector.broadcast %66 : vector<1x32xf32> to vector<10x32xf32>
    %68 = arith.addf %65, %67 : vector<10x32xf32>
    %c0_71 = arith.constant 0 : index
    %c0_72 = arith.constant 0 : index
    %c0_73 = arith.constant 0 : index
    %69 = vector.load %arg6[%c0_71, %c0_72, %c0_73] : memref<1x10x32xf32, #tpu.memory_space<vmem>>, vector<1x10x32xf32>
    %70 = vector.shape_cast %69 : vector<1x10x32xf32> to vector<10x32xf32>
    %71 = vector.shape_cast %68 : vector<10x32xf32> to vector<1x10x32xf32>
    tpu.vector_store %arg6[%c0_71, %c0_72, %c0_73], %71 {strides = array<i32>} : memref<1x10x32xf32, #tpu.memory_space<vmem>>, vector<1x10x32xf32>,
    return
  }
  func.func @transform_0(%arg0: i32) -> (i32, i32, i32, i32) {
    %c0_i32 = arith.constant 0 : i32
    %c0_i32_0 = arith.constant 0 : i32
    %c0_i32_1 = arith.constant 0 : i32
    %c0_i32_2 = arith.constant 0 : i32
    return %arg0, %c0_i32, %c0_i32_0, %c0_i32_1 : i32, i32, i32, i32
  }
  func.func @transform_1(%arg0: i32) -> (i32, i32, i32) {
    %c0_i32 = arith.constant 0 : i32
    %c0_i32_0 = arith.constant 0 : i32
    %c0_i32_1 = arith.constant 0 : i32
    %c0_i32_2 = arith.constant 0 : i32
    return %c0_i32, %c0_i32_0, %c0_i32_1 : i32, i32, i32
  }
  func.func @transform_2(%arg0: i32) -> (i32, i32) {
    %c0_i32 = arith.constant 0 : i32
    %c0_i32_0 = arith.constant 0 : i32
    %c0_i32_1 = arith.constant 0 : i32
    return %c0_i32, %c0_i32_0 : i32, i32
  }
  func.func @transform_3(%arg0: i32) -> (i32, i32) {
    %c0_i32 = arith.constant 0 : i32
    %c0_i32_0 = arith.constant 0 : i32
    %c0_i32_1 = arith.constant 0 : i32
    return %c0_i32, %c0_i32_0 : i32, i32
  }
  func.func @transform_4(%arg0: i32) -> (i32, i32) {
    %c0_i32 = arith.constant 0 : i32
    %c0_i32_0 = arith.constant 0 : i32
    %c0_i32_1 = arith.constant 0 : i32
    return %c0_i32, %c0_i32_0 : i32, i32
  }
  func.func @transform_5(%arg0: i32) -> (i32, i32, i32) {
    %c0_i32 = arith.constant 0 : i32
    %c0_i32_0 = arith.constant 0 : i32
    %c0_i32_1 = arith.constant 0 : i32
    return %arg0, %c0_i32, %c0_i32_0 : i32, i32, i32
  }
}

module attributes {stable_mosaic.version = 11 : i64} {
  func.func @kernel(%arg0: i32, %arg1: memref<1x4x9x32xbf16, #tpu.memory_space<vmem>>, %arg2: memref<9x32x32xbf16, #tpu.memory_space<vmem>>, %arg3: memref<1x32xf32, #tpu.memory_space<vmem>>, %arg4: memref<1x32xf32, #tpu.memory_space<vmem>>, %arg5: memref<1x32xf32, #tpu.memory_space<vmem>>, %arg6: memref<1x3x32xf32, #tpu.memory_space<vmem>>) attributes {dimension_semantics = [#tpu.dimension_semantics<parallel>], iteration_bounds = array<i64: 2>, scalar_prefetch = 0 : i64, scratch_operands = 0 : i64, tpu.core_type = #tpu.core_type<tc>, window_params = [{transform_indices = @transform_0, window_bounds = array<i64: 1, 4, 9, 32>}, {pipeline_mode = #tpu.pipeline_mode<synchronous>, transform_indices = @transform_1, window_bounds = array<i64: 9, 32, 32>}, {pipeline_mode = #tpu.pipeline_mode<synchronous>, transform_indices = @transform_2, window_bounds = array<i64: 1, 32>}, {pipeline_mode = #tpu.pipeline_mode<synchronous>, transform_indices = @transform_3, window_bounds = array<i64: 1, 32>}, {pipeline_mode = #tpu.pipeline_mode<synchronous>, transform_indices = @transform_4, window_bounds = array<i64: 1, 32>}, {transform_indices = @transform_5, window_bounds = array<i64: 1, 3, 32>}]} {
    %cst = arith.constant 0.000000e+00 : f32
    %0 = vector.broadcast %cst : f32 to vector<3x32xf32>
    %c0 = arith.constant 0 : index
    %c0_0 = arith.constant 0 : index
    %c0_1 = arith.constant 0 : index
    %c0_2 = arith.constant 0 : index
    %1 = vector.load %arg1[%c0, %c0_0, %c0_1, %c0_2] : memref<1x4x9x32xbf16, #tpu.memory_space<vmem>>, vector<1x1x3x32xbf16>
    %2 = vector.shape_cast %1 : vector<1x1x3x32xbf16> to vector<3x32xbf16>
    %c0_3 = arith.constant 0 : index
    %c0_4 = arith.constant 0 : index
    %c0_5 = arith.constant 0 : index
    %3 = vector.load %arg2[%c0_3, %c0_4, %c0_5] : memref<9x32x32xbf16, #tpu.memory_space<vmem>>, vector<1x32x32xbf16>
    %4 = vector.shape_cast %3 : vector<1x32x32xbf16> to vector<32x32xbf16>
    %cst_6 = arith.constant dense<0.000000e+00> : vector<3x32xf32>
    %5 = tpu.matmul %2, %4, %cst_6 {dimension_numbers = #tpu.dot_dimension_numbers<[1], [0], [0], [1], [0, 0, 1, 1], [], []>} : vector<3x32xbf16>, vector<32x32xbf16>, vector<3x32xf32> -> vector<3x32xf32>
    %6 = arith.addf %0, %5 : vector<3x32xf32>
    %c0_7 = arith.constant 0 : index
    %c1 = arith.constant 1 : index
    %c0_8 = arith.constant 0 : index
    %c0_9 = arith.constant 0 : index
    %7 = vector.load %arg1[%c0_7, %c1, %c0_8, %c0_9] : memref<1x4x9x32xbf16, #tpu.memory_space<vmem>>, vector<1x1x3x32xbf16>
    %8 = vector.shape_cast %7 : vector<1x1x3x32xbf16> to vector<3x32xbf16>
    %c1_10 = arith.constant 1 : index
    %c0_11 = arith.constant 0 : index
    %c0_12 = arith.constant 0 : index
    %9 = vector.load %arg2[%c1_10, %c0_11, %c0_12] : memref<9x32x32xbf16, #tpu.memory_space<vmem>>, vector<1x32x32xbf16>
    %10 = vector.shape_cast %9 : vector<1x32x32xbf16> to vector<32x32xbf16>
    %cst_13 = arith.constant dense<0.000000e+00> : vector<3x32xf32>
    %11 = tpu.matmul %8, %10, %cst_13 {dimension_numbers = #tpu.dot_dimension_numbers<[1], [0], [0], [1], [0, 0, 1, 1], [], []>} : vector<3x32xbf16>, vector<32x32xbf16>, vector<3x32xf32> -> vector<3x32xf32>
    %12 = arith.addf %6, %11 : vector<3x32xf32>
    %c0_14 = arith.constant 0 : index
    %c0_15 = arith.constant 0 : index
    %c1_16 = arith.constant 1 : index
    %c0_17 = arith.constant 0 : index
    %13 = vector.load %arg1[%c0_14, %c0_15, %c1_16, %c0_17] : memref<1x4x9x32xbf16, #tpu.memory_space<vmem>>, vector<1x1x3x32xbf16>
    %14 = vector.shape_cast %13 : vector<1x1x3x32xbf16> to vector<3x32xbf16>
    %c2 = arith.constant 2 : index
    %c0_18 = arith.constant 0 : index
    %c0_19 = arith.constant 0 : index
    %15 = vector.load %arg2[%c2, %c0_18, %c0_19] : memref<9x32x32xbf16, #tpu.memory_space<vmem>>, vector<1x32x32xbf16>
    %16 = vector.shape_cast %15 : vector<1x32x32xbf16> to vector<32x32xbf16>
    %cst_20 = arith.constant dense<0.000000e+00> : vector<3x32xf32>
    %17 = tpu.matmul %14, %16, %cst_20 {dimension_numbers = #tpu.dot_dimension_numbers<[1], [0], [0], [1], [0, 0, 1, 1], [], []>} : vector<3x32xbf16>, vector<32x32xbf16>, vector<3x32xf32> -> vector<3x32xf32>
    %18 = arith.addf %12, %17 : vector<3x32xf32>
    %c0_21 = arith.constant 0 : index
    %c2_22 = arith.constant 2 : index
    %c0_23 = arith.constant 0 : index
    %c0_24 = arith.constant 0 : index
    %19 = vector.load %arg1[%c0_21, %c2_22, %c0_23, %c0_24] : memref<1x4x9x32xbf16, #tpu.memory_space<vmem>>, vector<1x1x3x32xbf16>
    %20 = vector.shape_cast %19 : vector<1x1x3x32xbf16> to vector<3x32xbf16>
    %c3 = arith.constant 3 : index
    %c0_25 = arith.constant 0 : index
    %c0_26 = arith.constant 0 : index
    %21 = vector.load %arg2[%c3, %c0_25, %c0_26] : memref<9x32x32xbf16, #tpu.memory_space<vmem>>, vector<1x32x32xbf16>
    %22 = vector.shape_cast %21 : vector<1x32x32xbf16> to vector<32x32xbf16>
    %cst_27 = arith.constant dense<0.000000e+00> : vector<3x32xf32>
    %23 = tpu.matmul %20, %22, %cst_27 {dimension_numbers = #tpu.dot_dimension_numbers<[1], [0], [0], [1], [0, 0, 1, 1], [], []>} : vector<3x32xbf16>, vector<32x32xbf16>, vector<3x32xf32> -> vector<3x32xf32>
    %24 = arith.addf %18, %23 : vector<3x32xf32>
    %c0_28 = arith.constant 0 : index
    %c3_29 = arith.constant 3 : index
    %c0_30 = arith.constant 0 : index
    %c0_31 = arith.constant 0 : index
    %25 = vector.load %arg1[%c0_28, %c3_29, %c0_30, %c0_31] : memref<1x4x9x32xbf16, #tpu.memory_space<vmem>>, vector<1x1x3x32xbf16>
    %26 = vector.shape_cast %25 : vector<1x1x3x32xbf16> to vector<3x32xbf16>
    %c4 = arith.constant 4 : index
    %c0_32 = arith.constant 0 : index
    %c0_33 = arith.constant 0 : index
    %27 = vector.load %arg2[%c4, %c0_32, %c0_33] : memref<9x32x32xbf16, #tpu.memory_space<vmem>>, vector<1x32x32xbf16>
    %28 = vector.shape_cast %27 : vector<1x32x32xbf16> to vector<32x32xbf16>
    %cst_34 = arith.constant dense<0.000000e+00> : vector<3x32xf32>
    %29 = tpu.matmul %26, %28, %cst_34 {dimension_numbers = #tpu.dot_dimension_numbers<[1], [0], [0], [1], [0, 0, 1, 1], [], []>} : vector<3x32xbf16>, vector<32x32xbf16>, vector<3x32xf32> -> vector<3x32xf32>
    %30 = arith.addf %24, %29 : vector<3x32xf32>
    %c0_35 = arith.constant 0 : index
    %c2_36 = arith.constant 2 : index
    %c1_37 = arith.constant 1 : index
    %c0_38 = arith.constant 0 : index
    %31 = vector.load %arg1[%c0_35, %c2_36, %c1_37, %c0_38] : memref<1x4x9x32xbf16, #tpu.memory_space<vmem>>, vector<1x1x3x32xbf16>
    %32 = vector.shape_cast %31 : vector<1x1x3x32xbf16> to vector<3x32xbf16>
    %c5 = arith.constant 5 : index
    %c0_39 = arith.constant 0 : index
    %c0_40 = arith.constant 0 : index
    %33 = vector.load %arg2[%c5, %c0_39, %c0_40] : memref<9x32x32xbf16, #tpu.memory_space<vmem>>, vector<1x32x32xbf16>
    %34 = vector.shape_cast %33 : vector<1x32x32xbf16> to vector<32x32xbf16>
    %cst_41 = arith.constant dense<0.000000e+00> : vector<3x32xf32>
    %35 = tpu.matmul %32, %34, %cst_41 {dimension_numbers = #tpu.dot_dimension_numbers<[1], [0], [0], [1], [0, 0, 1, 1], [], []>} : vector<3x32xbf16>, vector<32x32xbf16>, vector<3x32xf32> -> vector<3x32xf32>
    %36 = arith.addf %30, %35 : vector<3x32xf32>
    %c0_42 = arith.constant 0 : index
    %c0_43 = arith.constant 0 : index
    %c3_44 = arith.constant 3 : index
    %c0_45 = arith.constant 0 : index
    %37 = vector.load %arg1[%c0_42, %c0_43, %c3_44, %c0_45] : memref<1x4x9x32xbf16, #tpu.memory_space<vmem>>, vector<1x1x3x32xbf16>
    %38 = vector.shape_cast %37 : vector<1x1x3x32xbf16> to vector<3x32xbf16>
    %c6 = arith.constant 6 : index
    %c0_46 = arith.constant 0 : index
    %c0_47 = arith.constant 0 : index
    %39 = vector.load %arg2[%c6, %c0_46, %c0_47] : memref<9x32x32xbf16, #tpu.memory_space<vmem>>, vector<1x32x32xbf16>
    %40 = vector.shape_cast %39 : vector<1x32x32xbf16> to vector<32x32xbf16>
    %cst_48 = arith.constant dense<0.000000e+00> : vector<3x32xf32>
    %41 = tpu.matmul %38, %40, %cst_48 {dimension_numbers = #tpu.dot_dimension_numbers<[1], [0], [0], [1], [0, 0, 1, 1], [], []>} : vector<3x32xbf16>, vector<32x32xbf16>, vector<3x32xf32> -> vector<3x32xf32>
    %42 = arith.addf %36, %41 : vector<3x32xf32>
    %c0_49 = arith.constant 0 : index
    %c1_50 = arith.constant 1 : index
    %c3_51 = arith.constant 3 : index
    %c0_52 = arith.constant 0 : index
    %43 = vector.load %arg1[%c0_49, %c1_50, %c3_51, %c0_52] : memref<1x4x9x32xbf16, #tpu.memory_space<vmem>>, vector<1x1x3x32xbf16>
    %44 = vector.shape_cast %43 : vector<1x1x3x32xbf16> to vector<3x32xbf16>
    %c7 = arith.constant 7 : index
    %c0_53 = arith.constant 0 : index
    %c0_54 = arith.constant 0 : index
    %45 = vector.load %arg2[%c7, %c0_53, %c0_54] : memref<9x32x32xbf16, #tpu.memory_space<vmem>>, vector<1x32x32xbf16>
    %46 = vector.shape_cast %45 : vector<1x32x32xbf16> to vector<32x32xbf16>
    %cst_55 = arith.constant dense<0.000000e+00> : vector<3x32xf32>
    %47 = tpu.matmul %44, %46, %cst_55 {dimension_numbers = #tpu.dot_dimension_numbers<[1], [0], [0], [1], [0, 0, 1, 1], [], []>} : vector<3x32xbf16>, vector<32x32xbf16>, vector<3x32xf32> -> vector<3x32xf32>
    %48 = arith.addf %42, %47 : vector<3x32xf32>
    %c0_56 = arith.constant 0 : index
    %c0_57 = arith.constant 0 : index
    %c4_58 = arith.constant 4 : index
    %c0_59 = arith.constant 0 : index
    %49 = vector.load %arg1[%c0_56, %c0_57, %c4_58, %c0_59] : memref<1x4x9x32xbf16, #tpu.memory_space<vmem>>, vector<1x1x3x32xbf16>
    %50 = vector.shape_cast %49 : vector<1x1x3x32xbf16> to vector<3x32xbf16>
    %c8 = arith.constant 8 : index
    %c0_60 = arith.constant 0 : index
    %c0_61 = arith.constant 0 : index
    %51 = vector.load %arg2[%c8, %c0_60, %c0_61] : memref<9x32x32xbf16, #tpu.memory_space<vmem>>, vector<1x32x32xbf16>
    %52 = vector.shape_cast %51 : vector<1x32x32xbf16> to vector<32x32xbf16>
    %cst_62 = arith.constant dense<0.000000e+00> : vector<3x32xf32>
    %53 = tpu.matmul %50, %52, %cst_62 {dimension_numbers = #tpu.dot_dimension_numbers<[1], [0], [0], [1], [0, 0, 1, 1], [], []>} : vector<3x32xbf16>, vector<32x32xbf16>, vector<3x32xf32> -> vector<3x32xf32>
    %54 = arith.addf %48, %53 : vector<3x32xf32>
    %c0_63 = arith.constant 0 : index
    %c0_64 = arith.constant 0 : index
    %55 = vector.load %arg3[%c0_63, %c0_64] : memref<1x32xf32, #tpu.memory_space<vmem>>, vector<1x32xf32>
    %56 = vector.broadcast %55 : vector<1x32xf32> to vector<3x32xf32>
    %57 = arith.addf %54, %56 : vector<3x32xf32>
    %cst_65 = arith.constant 0.000000e+00 : f32
    %58 = vector.broadcast %cst_65 : f32 to vector<3x32xf32>
    %59 = arith.cmpf ogt, %57, %58 : vector<3x32xf32>
    %cst_66 = arith.constant 2.000000e-01 : f32
    %60 = vector.broadcast %cst_66 : f32 to vector<3x32xf32>
    %61 = arith.mulf %60, %57 : vector<3x32xf32>
    %62 = arith.select %59, %57, %61 : vector<3x32xi1>, vector<3x32xf32>
    %c0_67 = arith.constant 0 : index
    %c0_68 = arith.constant 0 : index
    %63 = vector.load %arg4[%c0_67, %c0_68] : memref<1x32xf32, #tpu.memory_space<vmem>>, vector<1x32xf32>
    %64 = vector.broadcast %63 : vector<1x32xf32> to vector<3x32xf32>
    %65 = arith.mulf %62, %64 : vector<3x32xf32>
    %c0_69 = arith.constant 0 : index
    %c0_70 = arith.constant 0 : index
    %66 = vector.load %arg5[%c0_69, %c0_70] : memref<1x32xf32, #tpu.memory_space<vmem>>, vector<1x32xf32>
    %67 = vector.broadcast %66 : vector<1x32xf32> to vector<3x32xf32>
    %68 = arith.addf %65, %67 : vector<3x32xf32>
    %c0_71 = arith.constant 0 : index
    %c0_72 = arith.constant 0 : index
    %c0_73 = arith.constant 0 : index
    %69 = vector.load %arg6[%c0_71, %c0_72, %c0_73] : memref<1x3x32xf32, #tpu.memory_space<vmem>>, vector<1x3x32xf32>
    %70 = vector.shape_cast %69 : vector<1x3x32xf32> to vector<3x32xf32>
    %71 = vector.shape_cast %68 : vector<3x32xf32> to vector<1x3x32xf32>
    tpu.vector_store %arg6[%c0_71, %c0_72, %c0_73], %71 {strides = array<i32>} : memref<1x3x32xf32, #tpu.memory_space<vmem>>, vector<1x3x32xf32>,
    return
  }
  func.func @transform_0(%arg0: i32) -> (i32, i32, i32, i32) {
    %c0_i32 = arith.constant 0 : i32
    %c0_i32_0 = arith.constant 0 : i32
    %c0_i32_1 = arith.constant 0 : i32
    %c0_i32_2 = arith.constant 0 : i32
    return %arg0, %c0_i32, %c0_i32_0, %c0_i32_1 : i32, i32, i32, i32
  }
  func.func @transform_1(%arg0: i32) -> (i32, i32, i32) {
    %c0_i32 = arith.constant 0 : i32
    %c0_i32_0 = arith.constant 0 : i32
    %c0_i32_1 = arith.constant 0 : i32
    %c0_i32_2 = arith.constant 0 : i32
    return %c0_i32, %c0_i32_0, %c0_i32_1 : i32, i32, i32
  }
  func.func @transform_2(%arg0: i32) -> (i32, i32) {
    %c0_i32 = arith.constant 0 : i32
    %c0_i32_0 = arith.constant 0 : i32
    %c0_i32_1 = arith.constant 0 : i32
    return %c0_i32, %c0_i32_0 : i32, i32
  }
  func.func @transform_3(%arg0: i32) -> (i32, i32) {
    %c0_i32 = arith.constant 0 : i32
    %c0_i32_0 = arith.constant 0 : i32
    %c0_i32_1 = arith.constant 0 : i32
    return %c0_i32, %c0_i32_0 : i32, i32
  }
  func.func @transform_4(%arg0: i32) -> (i32, i32) {
    %c0_i32 = arith.constant 0 : i32
    %c0_i32_0 = arith.constant 0 : i32
    %c0_i32_1 = arith.constant 0 : i32
    return %c0_i32, %c0_i32_0 : i32, i32
  }
  func.func @transform_5(%arg0: i32) -> (i32, i32, i32) {
    %c0_i32 = arith.constant 0 : i32
    %c0_i32_0 = arith.constant 0 : i32
    %c0_i32_1 = arith.constant 0 : i32
    return %arg0, %c0_i32, %c0_i32_0 : i32, i32, i32
  }
}

module attributes {stable_mosaic.version = 11 : i64} {
  func.func @_linear_kernel(%arg0: i32, %arg1: memref<2x128xbf16, #tpu.memory_space<vmem>>, %arg2: memref<128x128xbf16, #tpu.memory_space<vmem>>, %arg3: memref<1x128xf32, #tpu.memory_space<vmem>>, %arg4: memref<2x128xf32, #tpu.memory_space<vmem>>, %arg5: memref<2x128xf32, #tpu.memory_space<vmem>>) attributes {dimension_semantics = [#tpu.dimension_semantics<arbitrary>], iteration_bounds = array<i64: 1>, scalar_prefetch = 0 : i64, scratch_operands = 1 : i64, tpu.core_type = #tpu.core_type<tc>, window_params = [{transform_indices = @transform_0, window_bounds = array<i64: 2, 128>}, {transform_indices = @transform_1, window_bounds = array<i64: 128, 128>}, {pipeline_mode = #tpu.pipeline_mode<synchronous>, transform_indices = @transform_2, window_bounds = array<i64: 1, 128>}, {pipeline_mode = #tpu.pipeline_mode<synchronous>, transform_indices = @transform_3, window_bounds = array<i64: 2, 128>}]} {
    %c0_i32 = arith.constant 0 : i32
    %0 = arith.cmpi eq, %arg0, %c0_i32 : i32
    %1 = arith.extui %0 : i1 to i32
    %c0_i32_0 = arith.constant 0 : i32
    %2 = arith.cmpi ne, %1, %c0_i32_0 : i32
    scf.if %2 {
      %cst_10 = arith.constant 0.000000e+00 : f32
      %12 = vector.broadcast %cst_10 : f32 to vector<2x128xf32>
      %c0_11 = arith.constant 0 : index
      %c0_12 = arith.constant 0 : index
      %13 = vector.load %arg5[%c0_11, %c0_12] : memref<2x128xf32, #tpu.memory_space<vmem>>, vector<2x128xf32>
      tpu.vector_store %arg5[%c0_11, %c0_12], %12 {strides = array<i32>} : memref<2x128xf32, #tpu.memory_space<vmem>>, vector<2x128xf32>,
    } else {
    }
    %c0 = arith.constant 0 : index
    %c0_1 = arith.constant 0 : index
    %3 = vector.load %arg5[%c0, %c0_1] : memref<2x128xf32, #tpu.memory_space<vmem>>, vector<2x128xf32>
    %c0_2 = arith.constant 0 : index
    %c0_3 = arith.constant 0 : index
    %4 = vector.load %arg1[%c0_2, %c0_3] : memref<2x128xbf16, #tpu.memory_space<vmem>>, vector<2x128xbf16>
    %c0_4 = arith.constant 0 : index
    %c0_5 = arith.constant 0 : index
    %5 = vector.load %arg2[%c0_4, %c0_5] : memref<128x128xbf16, #tpu.memory_space<vmem>>, vector<128x128xbf16>
    %cst = arith.constant dense<0.000000e+00> : vector<2x128xf32>
    %6 = tpu.matmul %4, %5, %cst {dimension_numbers = #tpu.dot_dimension_numbers<[1], [0], [0], [1], [0, 0, 1, 1], [], []>} : vector<2x128xbf16>, vector<128x128xbf16>, vector<2x128xf32> -> vector<2x128xf32>
    %7 = arith.addf %3, %6 : vector<2x128xf32>
    %c0_6 = arith.constant 0 : index
    %c0_7 = arith.constant 0 : index
    %8 = vector.load %arg5[%c0_6, %c0_7] : memref<2x128xf32, #tpu.memory_space<vmem>>, vector<2x128xf32>
    tpu.vector_store %arg5[%c0_6, %c0_7], %7 {strides = array<i32>} : memref<2x128xf32, #tpu.memory_space<vmem>>, vector<2x128xf32>,
    %c0_i32_8 = arith.constant 0 : i32
    %9 = arith.cmpi eq, %arg0, %c0_i32_8 : i32
    %10 = arith.extui %9 : i1 to i32
    %c0_i32_9 = arith.constant 0 : i32
    %11 = arith.cmpi ne, %10, %c0_i32_9 : i32
    scf.if %11 {
      %c0_10 = arith.constant 0 : index
      %c0_11 = arith.constant 0 : index
      %12 = vector.load %arg5[%c0_10, %c0_11] : memref<2x128xf32, #tpu.memory_space<vmem>>, vector<2x128xf32>
      %c0_12 = arith.constant 0 : index
      %c0_13 = arith.constant 0 : index
      %13 = vector.load %arg3[%c0_12, %c0_13] : memref<1x128xf32, #tpu.memory_space<vmem>>, vector<1x128xf32>
      %14 = vector.broadcast %13 : vector<1x128xf32> to vector<2x128xf32>
      %15 = arith.addf %12, %14 : vector<2x128xf32>
      %c0_14 = arith.constant 0 : index
      %c0_15 = arith.constant 0 : index
      %16 = vector.load %arg4[%c0_14, %c0_15] : memref<2x128xf32, #tpu.memory_space<vmem>>, vector<2x128xf32>
      tpu.vector_store %arg4[%c0_14, %c0_15], %15 {strides = array<i32>} : memref<2x128xf32, #tpu.memory_space<vmem>>, vector<2x128xf32>,
    } else {
    }
    return
  }
  func.func @transform_0(%arg0: i32) -> (i32, i32) {
    %c0_i32 = arith.constant 0 : i32
    %c0_i32_0 = arith.constant 0 : i32
    return %c0_i32, %arg0 : i32, i32
  }
  func.func @transform_1(%arg0: i32) -> (i32, i32) {
    %c0_i32 = arith.constant 0 : i32
    %c0_i32_0 = arith.constant 0 : i32
    return %arg0, %c0_i32 : i32, i32
  }
  func.func @transform_2(%arg0: i32) -> (i32, i32) {
    %c0_i32 = arith.constant 0 : i32
    %c0_i32_0 = arith.constant 0 : i32
    %c0_i32_1 = arith.constant 0 : i32
    return %c0_i32, %c0_i32_0 : i32, i32
  }
  func.func @transform_3(%arg0: i32) -> (i32, i32) {
    %c0_i32 = arith.constant 0 : i32
    %c0_i32_0 = arith.constant 0 : i32
    %c0_i32_1 = arith.constant 0 : i32
    return %c0_i32, %c0_i32_0 : i32, i32
  }
}

</mosaic_0001>

<bundles_post_ra>
// kernel: disc2d_forward.4
= control target key start
LH: loop header
LB: loop body
LE: loop exit
PB: predicated region body
PF: predicated region fallthrough
CT: control target
= control target key end

     0   :  { %s948_s12 = smov 0   ;;  %s1114_s0 = inlined_call_operand.vmem [shape: bf16[2,4,54,1], index: 0, kind: input, shape index: {}]   ;;  %s1115_s1 = inlined_call_operand.vmem [shape: bf16[9,1,32], index: 1, kind: input, shape index: {}]   ;;  %s1116_s2 = inlined_call_operand.vmem [shape: f32[1,32], index: 2, kind: input, shape index: {}]   ;;  %s1117_s3 = inlined_call_operand.vmem [shape: f32[2,36,32], index: 3, kind: output, shape index: {}]  }
   0x1 LB: > { %s743_s13 = sadd.s32 4294967295, %s925_s12   ;;  %p747_p0 = scmp.ge.s32.totalorder %s925_s12, 1  ;;  %s925_s12 = sphi %s948_s12, %s13_s12  }
   0x2   : > { %p137_p1 = scmp.lt.s32.totalorder %s925_s12, 3 }
   0x4   : > { %p138_p2 = pnand %p747_p0, %p137_p1 }
   0x5   : > { %p161_p3 = scmp.lt.s32.totalorder (!%p138_p2), %s743_s13, 1 }
   0x6   : > { %141 = sbr.rel (%p138_p2) target bundleno = 195 (0xc3), region = 32 }
   0xb   : > { %v927_v0 = vmov 0   ;;  %s1119_s13 = smov (!%p161_p3, %s743_s13), 1  ;;  %vm299_vm0 = vcmask 1046528   ;;  %vm634_vm1 = vcmask 1045504   ;;  %vm681_vm2 = vcmask 261120  }
   0xc   : > { %848 = vset.pattern.permute.xlu1 %v927_v0  ;;  %837 = vset.pattern.permute.xlu0 %v927_v0  ;;  %s826_s14 = smul.u32 112, %s1119_s13  ;;  %vm686_vm3 = vcmask 257024  }
   0xd   : > { %s827_s11 = smul.u32 40, %s1119_s13 }
   0xe   : > { %s962_s17 = scalar_lea.vmem %s1114_s0, %s826_s14 }
   0xf   : > { %v175_v1 = vld [vmem:[%s962_s17 + $0x10] sm:$0x3]  ;;  %v750_v2 = vld [vmem:[%s962_s17 + $0x1c] ss:$12 sps:$4 sm:$0xff]   ;;  %v783_v3 = vld [vmem:[%s962_s17] sm:$0xff]   ;;  %s170_s15 = scalar_lea.vmem %s1117_s3, %s827_s11 }
  0x10   : > { %v180_v4 = vunpack.c.l.bf16 %v175_v1  ;;  %v228_v5 = vunpack.c.l.bf16 %v750_v2  ;;  %v784_v6 = vunpack.c.l.bf16 %v783_v3  ;;  %v785_v7 = vunpack.c.h.bf16 %v783_v3  ;;  %v968_v8 = vld [vmem:[%s962_s17 + $0x20] sm:$0xff]   ;;  %v818_v9 = vld [vmem:[%s962_s17 + $0x8] sm:$0xff]   ;;  %v275_v10 = vld [vmem:[%s962_s17 + $0x10] sm:$0x7] }
  0x11   : > { %v792_v11 = vunpack.c.l.bf16 %v968_v8  ;;  %v793_v12 = vunpack.c.h.bf16 %v968_v8  ;;  %v788_v13 = vunpack.c.l.bf16 %v818_v9  ;;  %v789_v14 = vunpack.c.h.bf16 %v818_v9  ;;  %v820_v15 = vld [vmem:[%s962_s17 + $0x38] sm:$0xff]   ;;  %v754_v16 = vld [vmem:[%s962_s17 + $0x2c] sm:$0x3]  ;;  %v821_v25 = vld [vmem:[%s962_s17 + $0x40] sm:$0xff]  }
  0x12   : > { %v849_v17 = vpack.i.bf16 %v228_v5, %v180_v4  ;;  %v838_v18 = vpack.i.bf16 %v785_v7, %v784_v6  ;;  %v276_v19 = vunpack.c.l.bf16 %v275_v10  ;;  %v796_v20 = vunpack.c.l.bf16 %v820_v15  ;;  %v761_v26 = vld [vmem:[%s962_s17 + $0x48] sm:$0x3]  ;;  %v822_v33 = vld [vmem:[%s962_s17 + $0x58] sm:$0xff]   ;;  %v763_v34 = vld [vmem:[%s962_s17 + $0x4] ss:$80 sps:$4 sm:$0xff]  }
  0x13   : > { %v854_v21 = vpack.i.bf16 %v793_v12, %v792_v11  ;;  %v843_v22 = vpack.i.bf16 %v789_v14, %v788_v13  ;;  %v231_v23 = vunpack.c.h.bf16 %v750_v2  ;;  %v232_v24 = vunpack.c.l.bf16 %v754_v16  ;;  %v769_v35 = vld [vmem:[%s962_s17 + $0x48] sm:$0x7]  ;;  %v766_v42 = vld [vmem:[%s962_s17 + $0x10] ss:$80 sps:$4 sm:$0xff]   ;;  %v767_v43 = vld [vmem:[%s962_s17 + $0x64] sm:$0x3] }
  0x14   : > { %850 = vperm.xlu1 %848, %v849_v17   ;;  %839 = vperm.xlu0 %837, %v838_v18   ;;  %v864_v27 = vpack.i.bf16 %v796_v20, %v276_v19  ;;  %v801_v28 = vunpack.c.h.bf16 %v821_v25  ;;  %v329_v30 = vunpack.c.l.bf16 %v761_v26  ;;  %v797_v31 = vunpack.c.h.bf16 %v820_v15  ;;  %v472_v49 = vld [vmem:[%s962_s17 + $0x14] sm:$0x7]  ;;  %v825_v54 = vld [vmem:[%s962_s17 + $0x28] sm:$0xff]   ;;  %v776_v55 = vld [vmem:[%s962_s17 + $0x30] sm:$0x7] }
  0x15   : > { %v859_v29 = vpack.i.bf16 %v232_v24, %v231_v23  ;;  %v800_v32 = vunpack.c.l.bf16 %v821_v25  ;;  %v804_v36 = vunpack.c.l.bf16 %v822_v33  ;;  %v805_v37 = vunpack.c.h.bf16 %v822_v33  ;;  %v610_v63 = vld [vmem:[%s962_s17 + $0x4] sm:$0xe]  ;;  %v756_v3 = vld [vmem:[%s1115_s1 + $0x2] sm:$0x1]  ;;  %v181_v4 = vld [vmem:[%s1115_s1] sm:$0x1] }
  0x16   : > { %v874_v38 = vpack.i.bf16 %v329_v30, %v801_v28  ;;  %v378_v40 = vunpack.c.h.bf16 %v763_v34  ;;  %v426_v41 = vunpack.c.l.bf16 %v769_v35  ;;  %v473_v44 = vunpack.c.l.bf16 %v763_v34  ;;  %v755_v5 = vld [vmem:[%s1115_s1 + $0x1] sm:$0x1]  ;;  %v762_v8 = vld [vmem:[%s1115_s1 + $0x3] sm:$0x1]  ;;  %v771_v17 = vld [vmem:[%s1115_s1 + $0x6] sm:$0x1] }
  0x17   : > { %v869_v39 = vpack.i.bf16 %v800_v32, %v797_v31  ;;  %v884_v45 = vpack.i.bf16 %v805_v37, %v804_v36  ;;  %v381_v47 = vunpack.c.h.bf16 %v766_v42  ;;  %v382_v48 = vunpack.c.l.bf16 %v767_v43  ;;  %v778_v18 = vld [vmem:[%s1115_s1 + $0x8] sm:$0x1]  ;;  %v777_v19 = vld [vmem:[%s1115_s1 + $0x7] sm:$0x1] }
  0x18   : > { %855 = vperm.xlu1 %848, %v854_v21   ;;  %844 = vperm.xlu0 %837, %v843_v22   ;;  %v879_v46 = vpack.i.bf16 %v378_v40, %v426_v41  ;;  %v894_v50 = vpack.i.bf16 %v788_v13, %v473_v44  ;;  %v477_v52 = vunpack.c.l.bf16 %v472_v49  ;;  %v476_v53 = vunpack.c.l.bf16 %v766_v42 }
  0x19   : > { %v889_v51 = vpack.i.bf16 %v382_v48, %v381_v47  ;;  %v817_v56 = vunpack.c.h.bf16 %v825_v54  ;;  %v548_v59 = vunpack.c.l.bf16 %v776_v55  ;;  %v816_v60 = vunpack.c.l.bf16 %v825_v54 }
  0x1a   : > { %v904_v57 = vpack.i.bf16 %v792_v11, %v477_v52  ;;  %v899_v58 = vpack.i.bf16 %v476_v53, %v789_v14  ;;  %v611_v0 = vunpack.c.l.bf16 %v610_v63  ;;  %v208_v1 = vlaneseq  ;;  %v770_v11 = vld [vmem:[%s1115_s1 + $0x5] sm:$0x1] }
  0x1b   : > { %v914_v61 = vpack.i.bf16 %v548_v59, %v817_v56  ;;  %v909_v62 = vpack.i.bf16 %v816_v60, %v793_v12  ;;  %v279_v7 = vunpack.c.l.bf16 %v756_v3  ;;  %v182_v9 = vunpack.c.l.bf16 %v181_v4  ;;  %v768_v12 = vld [vmem:[%s1115_s1 + $0x4] sm:$0x1] }
  0x1c   : > { %865 = vperm.xlu1 %848, %v864_v27   ;;  %860 = vperm.xlu0 %837, %v859_v29   ;;  %v209_v2 = vshrl.u32 %v208_v1, 7  ;;  %v235_v10 = vunpack.c.l.bf16 %v755_v5  ;;  %v332_v16 = vunpack.c.l.bf16 %v762_v8  ;;  %v429_v22 = vunpack.c.l.bf16 %v770_v11 }
  0x1d   : > { %v385_v26 = vunpack.c.l.bf16 %v768_v12  ;;  %v480_v27 = vunpack.c.l.bf16 %v771_v17  ;;  %v614_v28 = vunpack.c.l.bf16 %v778_v18  ;;  %v551_v29 = vunpack.c.l.bf16 %v777_v19 }
  0x1e   : > { %v210_v6 = vsub.s32 0, %v209_v2 }
  0x20   : > { %875 = vperm.xlu1 %848, %v874_v38   ;;  %870 = vperm.xlu0 %837, %v869_v39   ;;  %v288_v14 = vrot.slane %v279_v7, %v210_v6  ;;  %v211_v23 = vrot.slane %v182_v9, %v210_v6  ;;  %v264_v24 = vrot.slane %v235_v10, %v210_v6 }
  0x21   : > { %v1020_v34 = vrot.slane %v332_v16, %v210_v6  ;;  %v1022_v38 = vrot.slane %v429_v22, %v210_v6  ;;  %v1024_v43 = vrot.slane %v385_v26, %v210_v6  ;;  %v1026_v44 = vrot.slane %v480_v27, %v210_v6 }
  0x24   : > { %885 = vperm.xlu1 %848, %v884_v45   ;;  %880 = vperm.xlu0 %837, %v879_v46   ;;  %v1028_v45 = vrot.slane %v614_v28, %v210_v6  ;;  %v1030_v46 = vrot.slane %v551_v29, %v210_v6 }
  0x28   : > { %895 = vperm.xlu1 %848, %v894_v50   ;;  %890 = vperm.xlu0 %837, %v889_v51  }
  0x2c   : > { %905 = vperm.xlu1 %848, %v904_v57   ;;  %900 = vperm.xlu0 %837, %v899_v58  }
  0x30   : > { %915 = vperm.xlu1 %848, %v914_v61   ;;  %910 = vperm.xlu0 %837, %v909_v62  }
  0x34   : > { %617 = vperm.xlu0 %837, %v611_v0  }
  0x8f   : > { %v851_v13 = vpop.permute.xlu1 %850  ;;  %v840_v15 = vpop.permute.xlu0 %839 }
  0x90   : > { %v842_v20 = vunpack.i.h.bf16 %v840_v15  ;;  %v841_v21 = vunpack.i.l.bf16 %v840_v15  ;;  %v853_v25 = vunpack.i.h.bf16 %v851_v13  ;;  %v852_v35 = vunpack.i.l.bf16 %v851_v13 }
  0x92   : > { %v1018_v30 = vmul.f32 %v842_v20, %v288_v14  ;;  %v289_v31 = vmul.f32 %v841_v21, %v288_v14  ;;  %v265_v39 = vmul.f32 %v853_v25, %v264_v24  ;;  %v212_v40 = vmul.f32 %v841_v21, %v211_v23 }
  0x93   : > { %v856_v32 = vpop.permute.xlu1 %855  ;;  %v845_v33 = vpop.permute.xlu0 %844  ;;  %v216_v53 = vmul.f32 %v852_v35, %v211_v23  ;;  %v213_v57 = vmul.f32 %v842_v20, %v211_v23 }
  0x94   : > { %v857_v36 = vunpack.i.l.bf16 %v856_v32  ;;  %v847_v37 = vunpack.i.h.bf16 %v845_v33  ;;  %v858_v41 = vunpack.i.h.bf16 %v856_v32  ;;  %v846_v42 = vunpack.i.l.bf16 %v845_v33 }
  0x95   : > { %v301_v47 = vrot.slane %v1018_v30, 1  ;;  %v300_v48 = vrot.slane %v289_v31, 1  ;;  %v270_v58 = vadd.f32 %v265_v39, %v212_v40 }
  0x96   : > { %v292_v49 = vmul.f32 %v847_v37, %v288_v14  ;;  %v291_v50 = vmul.f32 %v846_v42, %v288_v14  ;;  %v266_v54 = vmul.f32 %v857_v36, %v264_v24  ;;  %v267_v59 = vmul.f32 %v858_v41, %v264_v24 }
  0x97   : > { %v866_v51 = vpop.permute.xlu1 %865  ;;  %v861_v52 = vpop.permute.xlu0 %860  ;;  %v215_v61 = vmul.f32 %v847_v37, %v211_v23  ;;  %v214_v62 = vmul.f32 %v846_v42, %v211_v23  ;;  %v302_v3 = vsel %vm299_vm0, %v300_v48, %v301_v47 }
  0x98   : > { %v868_v55 = vunpack.i.h.bf16 %v866_v51  ;;  %v867_v56 = vunpack.i.l.bf16 %v866_v51  ;;  %v863_v60 = vunpack.i.h.bf16 %v861_v52  ;;  %v862_v0 = vunpack.i.l.bf16 %v861_v52 }
  0x99   : > { %v305_v1 = vrot.slane %v292_v49, 1  ;;  %v303_v2 = vrot.slane %v291_v50, 1  ;;  %v271_v7 = vadd.f32 %v266_v54, %v213_v57  ;;  %v272_v16 = vadd.f32 %v267_v59, %v214_v62 }
  0x9a   : > { %v293_v63 = vmul.f32 %v867_v56, %v288_v14  ;;  %v269_v4 = vmul.f32 %v863_v60, %v264_v24  ;;  %v439_v8 = vmul.f32 %v868_v55, %v1022_v38  ;;  %v268_v10 = vmul.f32 %v862_v0, %v264_v24 }
  0x9b   : > { %v876_v5 = vpop.permute.xlu1 %875  ;;  %v871_v6 = vpop.permute.xlu0 %870  ;;  %v362_v19 = vmul.f32 %v868_v55, %v1020_v34  ;;  %v314_v20 = vadd.f32 %v302_v3, %v270_v58  ;;  %v306_v22 = vsel %vm299_vm0, %v303_v2, %v305_v1  ;;  %v304_v28 = vsel %vm299_vm0, %v301_v47, %v303_v2 }
  0x9c   : > { %v307_v9 = vrot.slane %v293_v63, 1  ;;  %v274_v11 = vadd.f32 %v269_v4, %v216_v53  ;;  %v878_v12 = vunpack.i.h.bf16 %v876_v5  ;;  %v877_v13 = vunpack.i.l.bf16 %v876_v5 }
  0x9d   : > { %v873_v15 = vunpack.i.h.bf16 %v871_v6  ;;  %v273_v17 = vadd.f32 %v268_v10, %v215_v61  ;;  %v872_v18 = vunpack.i.l.bf16 %v871_v6  ;;  %v449_v24 = vrot.slane %v439_v8, 1 }
  0x9e   : > { %v308_v14 = vsel %vm299_vm0, %v305_v1, %v307_v9  ;;  %v1038_v21 = vmul.f32 %v877_v13, %v1022_v38  ;;  %v366_v26 = vmul.f32 %v878_v12, %v1020_v34  ;;  %v318_v30 = vadd.f32 %v307_v9, %v274_v11 }
  0x9f   : > { %v886_v23 = vpop.permute.xlu1 %885  ;;  %v881_v25 = vpop.permute.xlu0 %880  ;;  %v441_v27 = vmul.f32 %v873_v15, %v1022_v38  ;;  %v317_v29 = vadd.f32 %v308_v14, %v273_v17  ;;  %v365_v31 = vmul.f32 %v877_v13, %v1020_v34  ;;  %v440_v32 = vmul.f32 %v872_v18, %v1022_v38 }
  0xa0   : > { %v454_v33 = vrot.slane %v1038_v21, 1  ;;  %v364_v35 = vmul.f32 %v873_v15, %v1020_v34  ;;  %v316_v36 = vadd.f32 %v306_v22, %v272_v16  ;;  %v888_v37 = vunpack.i.h.bf16 %v886_v23 }
  0xa1   : > { %v452_v39 = vrot.slane %v441_v27, 1  ;;  %v363_v40 = vmul.f32 %v872_v18, %v1020_v34  ;;  %v887_v41 = vunpack.i.l.bf16 %v886_v23  ;;  %v883_v42 = vunpack.i.h.bf16 %v881_v25 }
  0xa2   : > { %v450_v47 = vrot.slane %v440_v32, 1  ;;  %v417_v50 = vmul.f32 %v888_v37, %v1024_v43  ;;  %v882_v51 = vunpack.i.l.bf16 %v881_v25  ;;  %v367_v53 = vadd.f32 %v362_v19, %v314_v20 }
  0xa3   : > { %v896_v48 = vpop.permute.xlu1 %895  ;;  %v891_v49 = vpop.permute.xlu0 %890  ;;  %v371_v54 = vadd.f32 %v366_v26, %v318_v30  ;;  %v315_v55 = vadd.f32 %v304_v28, %v271_v7  ;;  %v416_v56 = vmul.f32 %v887_v41, %v1024_v43  ;;  %v370_v57 = vadd.f32 %v365_v31, %v317_v29 }
  0xa4   : > { %v898_v52 = vunpack.i.h.bf16 %v896_v48  ;;  %v369_v58 = vadd.f32 %v364_v35, %v316_v36  ;;  %v415_v59 = vmul.f32 %v883_v42, %v1024_v43  ;;  %v455_v61 = vsel %vm299_vm0, %v452_v39, %v454_v33 }
  0xa5   : > { %v368_v60 = vadd.f32 %v363_v40, %v315_v55  ;;  %v897_v62 = vunpack.i.l.bf16 %v896_v48  ;;  %v893_v63 = vunpack.i.h.bf16 %v891_v49  ;;  %v453_v3 = vsel %vm299_vm0, %v450_v47, %v452_v39 }
  0xa6   : > { %v1053_v34 = vmul.f32 %v898_v52, %v1026_v44  ;;  %v422_v2 = vadd.f32 %v417_v50, %v369_v58  ;;  %v443_v4 = vmul.f32 %v882_v51, %v1022_v38  ;;  %v451_v5 = vsel %vm299_vm0, %v449_v24, %v450_v47 }
  0xa7   : > { %v906_v0 = vpop.permute.xlu1 %905  ;;  %v901_v1 = vpop.permute.xlu0 %900  ;;  %v421_v6 = vadd.f32 %v416_v56, %v368_v60  ;;  %v1062_v7 = vmul.f32 %v898_v52, %v1028_v45  ;;  %v510_v8 = vmul.f32 %v897_v62, %v1026_v44  ;;  %v419_v9 = vmul.f32 %v893_v63, %v1024_v43 }
  0xa8   : > { %v420_v10 = vadd.f32 %v415_v59, %v367_v53  ;;  %v521_v11 = vrot.slane %v1053_v34, 1  ;;  %v892_v12 = vunpack.i.l.bf16 %v891_v49  ;;  %v907_v13 = vunpack.i.l.bf16 %v906_v0 }
  0xa9   : > { %v520_v15 = vrot.slane %v510_v8, 1  ;;  %v908_v16 = vunpack.i.h.bf16 %v906_v0  ;;  %v903_v17 = vunpack.i.h.bf16 %v901_v1  ;;  %v902_v38 = vunpack.i.l.bf16 %v901_v1 }
  0xaa   : > { %v456_v14 = vrot.slane %v443_v4, 1  ;;  %v418_v18 = vmul.f32 %v892_v12, %v1024_v43  ;;  %v424_v19 = vadd.f32 %v419_v9, %v371_v54  ;;  %v514_v20 = vmul.f32 %v907_v13, %v1026_v44 }
  0xab   : > { %v465_v22 = vadd.f32 %v455_v61, %v422_v2  ;;  %v636_v23 = vrot.slane %v1062_v7, 2  ;;  %v628_v25 = vmul.f32 %v907_v13, %v1028_v45  ;;  %v513_v24 = vmul.f32 %v903_v17, %v1026_v44  ;;  %v916_v26 = vpop.permute.xlu1 %915  ;;  %v911_v27 = vpop.permute.xlu0 %910 }
  0xac   : > { %v464_v28 = vadd.f32 %v453_v3, %v421_v6  ;;  %v463_v29 = vadd.f32 %v451_v5, %v420_v10  ;;  %v522_v30 = vsel %vm299_vm0, %v520_v15, %v521_v11  ;;  %v627_v31 = vmul.f32 %v903_v17, %v1028_v45  ;;  %v779_v10 = vld [vmem:[%s1116_s2] ss:$0 sm:$0xff] }
  0xad   : > { %v581_v43 = vmul.f32 %v908_v16, %v1030_v46  ;;  %v527_v32 = vrot.slane %v514_v20, 1  ;;  %v525_v35 = vrot.slane %v513_v24, 1  ;;  %v512_v36 = vmul.f32 %v902_v38, %v1026_v44 }
  0xae   : > { %v423_v37 = vadd.f32 %v418_v18, %v370_v57  ;;  %v457_v39 = vsel %vm299_vm0, %v454_v33, %v456_v14  ;;  %v467_v40 = vadd.f32 %v456_v14, %v424_v19  ;;  %v918_v41 = vunpack.i.h.bf16 %v916_v26 }
  0xaf   : > { %v534_v42 = vadd.f32 %v522_v30, %v463_v29  ;;  %v642_v48 = vrot.slane %v628_v25, 2  ;;  %v523_v49 = vrot.slane %v512_v36, 1  ;;  %v917_v47 = vunpack.i.l.bf16 %v916_v26  ;;  %v618_v56 = vpop.permute.xlu0 %617 }
  0xb0   : > { %v640_v50 = vrot.slane %v627_v31, 2  ;;  %v626_v51 = vmul.f32 %v902_v38, %v1028_v45  ;;  %v585_v52 = vmul.f32 %v918_v41, %v1030_v46  ;;  %v913_v53 = vunpack.i.h.bf16 %v911_v27 }
  0xb1   : > { %v591_v54 = vrot.slane %v581_v43, 1  ;;  %v528_v44 = vsel %vm299_vm0, %v525_v35, %v527_v32  ;;  %v584_v55 = vmul.f32 %v917_v47, %v1030_v46  ;;  %v912_v21 = vunpack.i.l.bf16 %v911_v27 }
  0xb2   : > { %v466_v33 = vadd.f32 %v457_v39, %v423_v37  ;;  %v538_v57 = vadd.f32 %v527_v32, %v467_v40  ;;  %v524_v58 = vsel %vm299_vm0, %v521_v11, %v523_v49  ;;  %v526_v59 = vsel %vm299_vm0, %v523_v49, %v525_v35 }
  0xb3   : > { %v598_v34 = vrot.slane %v585_v52, 1  ;;  %v596_v60 = vrot.slane %v584_v55, 1  ;;  %v583_v61 = vmul.f32 %v913_v53, %v1030_v46  ;;  %v582_v62 = vmul.f32 %v912_v21, %v1030_v46 }
  0xb4   : > { %v643_v63 = vsel %vm634_vm1, %v640_v50, %v642_v48  ;;  %v537_v0 = vadd.f32 %v528_v44, %v466_v33  ;;  %v638_v1 = vrot.slane %v626_v51, 2  ;;  %v624_v2 = vmul.f32 %v1028_v45, %v618_v56 }
  0xb5   : > { %v599_v3 = vsel %vm299_vm0, %v596_v60, %v598_v34  ;;  %v609_v4 = vadd.f32 %v598_v34, %v538_v57  ;;  %v594_v5 = vrot.slane %v583_v61, 1  ;;  %v592_v6 = vrot.slane %v582_v62, 1 }
  0xb6   : > { %v535_v8 = vadd.f32 %v524_v58, %v464_v28  ;;  %v536_v9 = vadd.f32 %v526_v59, %v465_v22  ;;  %v608_v11 = vadd.f32 %v599_v3, %v537_v0  ;;  %v635_v12 = vrot.slane %v624_v2, 2 }
  0xb7   : > { %v653_v46 = vadd.f32 %v642_v48, %v609_v4  ;;  %v597_v13 = vsel %vm299_vm0, %v594_v5, %v596_v60  ;;  %v593_v15 = vsel %vm299_vm0, %v591_v54, %v592_v6  ;;  %v595_v45 = vsel %vm299_vm0, %v592_v6, %v594_v5 }
  0xb8   : > { %v652_v16 = vadd.f32 %v643_v63, %v608_v11  ;;  %v606_v17 = vadd.f32 %v595_v45, %v535_v8  ;;  %v607_v38 = vadd.f32 %v597_v13, %v536_v9  ;;  %v605_v14 = vadd.f32 %v593_v15, %v534_v42 }
  0xb9   : > { %v639_v18 = vsel %vm634_vm1, %v636_v23, %v638_v1  ;;  %v641_v19 = vsel %vm634_vm1, %v638_v1, %v640_v50  ;;  %v665_v20 = vadd.f32 %v779_v10, %v653_v46  ;;  %v637_v22 = vsel %vm634_vm1, %v635_v12, %v636_v23 }
  0xba   : > { %v664_v25 = vadd.f32 %v779_v10, %v652_v16  ;;  %v650_v24 = vadd.f32 %v639_v18, %v606_v17  ;;  %v651_v26 = vadd.f32 %v641_v19, %v607_v38  ;;  %v649_v27 = vadd.f32 %v637_v22, %v605_v14 }
  0xbb   : > { %vm670_vm4 = vcmp.gt.f32.partialorder %v665_v20, 0.0  ;;  %v675_v28 = vmul.f32 0.2, %v665_v20 }
  0xbc   : > { %vm669_vm5 = vcmp.gt.f32.partialorder %v664_v25, 0.0  ;;  %v674_v29 = vmul.f32 0.2, %v664_v25  ;;  %v662_v30 = vadd.f32 %v779_v10, %v650_v24  ;;  %v663_v31 = vadd.f32 %v779_v10, %v651_v26 }
  0xbd   : > { %v680_v43 = vsel %vm670_vm4, %v665_v20, %v675_v28  ;;  %v661_v7 = vadd.f32 %v779_v10, %v649_v27 }
  0xbe   : > { %v679_v32 = vsel %vm669_vm5, %v664_v25, %v674_v29  ;;  %687 = vst.msk [vmem:[%s170_s15 + $0x20] sm:$0xf] %vm686_vm3, %v680_v43  ;;  %vm667_vm6 = vcmp.gt.f32.partialorder %v662_v30, 0.0  ;;  %vm668_vm7 = vcmp.gt.f32.partialorder %v663_v31, 0.0  ;;  %v672_v23 = vmul.f32 0.2, %v662_v30 }
  0xbf   : > { %685 = vst.msk [vmem:[%s170_s15 + $0x18] sm:$0xff] %vm681_vm2, %v679_v32  ;;  %v673_v35 = vmul.f32 0.2, %v663_v31  ;;  %vm666_vm8 = vcmp.gt.f32.partialorder %v661_v7, 0.0  ;;  %v671_v36 = vmul.f32 0.2, %v661_v7 }
  0xc0   : > { %v677_v37 = vsel %vm667_vm6, %v662_v30, %v672_v23 }
  0xc1   : > { %v678_v39 = vsel %vm668_vm7, %v663_v31, %v673_v35  ;;  %683 = vst.msk [vmem:[%s170_s15 + $0x8] sm:$0xff] %vm681_vm2, %v677_v37  ;;  %v676_v40 = vsel %vm666_vm8, %v661_v7, %v671_v36 }
  0xc2   : > { %684 = vst.msk [vmem:[%s170_s15 + $0x10] sm:$0xff] %vm681_vm2, %v678_v39  ;;  %682 = vst.msk [vmem:[%s170_s15] sm:$0xff] %vm681_vm2, %v676_v40 }
  0xc3 PF: > { %s13_s12 = sadd.s32 1, %s925_s12  }
  0xc4   : > { %p10_p4 = scmp.ge.s32.totalorder %s13_s12, 4  }
  0xc6   :  { %12 = sbr.rel (!%p10_p4) target bundleno = 1 (0x1), region = 73 }

// kernel: disc2d_forward.5
= control target key start
LH: loop header
LB: loop body
LE: loop exit
PB: predicated region body
PF: predicated region fallthrough
CT: control target
= control target key end

     0   :  { %s1236_s18 = smov 0   ;;  %s1380_s0 = inlined_call_operand.vmem [shape: bf16[2,4,20,32], index: 0, kind: input, shape index: {}]   ;;  %s1381_s1 = inlined_call_operand.vmem [shape: bf16[9,32,32], index: 1, kind: input, shape index: {}]   ;;  %s1382_s2 = inlined_call_operand.vmem [shape: f32[1,32], index: 2, kind: input, shape index: {}]   ;;  %s1383_s3 = inlined_call_operand.vmem [shape: f32[1,32], index: 3, kind: input, shape index: {}]   ;;  %s1384_s4 = inlined_call_operand.vmem [shape: f32[1,32], index: 4, kind: input, shape index: {}]   ;;  %s1385_s5 = inlined_call_operand.vmem [shape: f32[2,10,32], index: 5, kind: output, shape index: {}]  }
   0x1 LB: > { %s968_s19 = sadd.s32 4294967295, %s1202_s18   ;;  %p972_p0 = scmp.ge.s32.totalorder %s1202_s18, 1  ;;  %s1202_s18 = sphi %s1236_s18, %s15_s18  }
   0x2   : > { %p187_p1 = scmp.lt.s32.totalorder %s1202_s18, 3 }
   0x4   : > { %p188_p2 = pnand %p972_p0, %p187_p1 }
   0x5   : > { %p215_p3 = scmp.lt.s32.totalorder (!%p188_p2), %s968_s19, 1 }
   0x6   : > { %191 = sbr.rel (%p188_p2) target bundleno = 261 (0x105), region = 40 }
   0xb   : > { %v1169_v0 = vld [vmem:[%s1381_s1 + $0x18] sm:$0xff]   ;;  %v1204_v1 = vmov 0.0   ;;  %v1170_v2 = vld [vmem:[%s1381_s1 + $0x8] sm:$0xff]   ;;  %v1171_v3 = vld [vmem:[%s1381_s1 + $0x10] sm:$0xff]   ;;  %vm1205_vm0 = vmmov 0   ;;  %s1387_s19 = smov (!%p215_p3, %s968_s19), 1 }
   0xc   : > { %1086 = vmatprep.subr.bf16.mxu0 %v1204_v1  ;;  %1094 = vmatprep.subr.bf16.mxu1 %v1204_v1  ;;  %v1172_v4 = vld [vmem:[%s1381_s1] sm:$0xff]   ;;  %s1158_s28 = smul.u32 48, %s1387_s19  ;;  %v1176_v5 = vld [vmem:[%s1381_s1 + $0x28] sm:$0xff]   ;;  %vm257_vm1 = vcmask 261120   ;;  %v1177_v6 = vld [vmem:[%s1381_s1 + $0x38] sm:$0xff]   ;;  %s1058_s16 = sshll.u32 %s1387_s19, 4 }
   0xd   : > { %1087 = vmatpush3.bf16.msra.mxu0 %v1169_v0  ;;  %1090 = vmatprep.mubr.msk.bf16.mxu0 %vm1205_vm0, %v1204_v1  ;;  %v1178_v13 = vld [vmem:[%s1381_s1 + $0x20] sm:$0xff]   ;;  %v1179_v16 = vld [vmem:[%s1381_s1 + $0x30] sm:$0xff]   ;;  %v1182_v22 = vld [vmem:[%s1381_s1 + $0x48] sm:$0xff]   ;;  %s224_s23 = scalar_lea.vmem %s1385_s5, %s1058_s16  ;;  %vm911_vm4 = vcmask 254976  }
   0xe   : > { %1095 = vmatpush3.bf16.msra.mxu1 %v1170_v2  ;;  %1088 = vmatprep.subr.bf16.mxu0 %v1204_v1  ;;  %s1274_s8 = scalar_lea.vmem %s1380_s0, %s1158_s28  ;;  %v1183_v26 = vld [vmem:[%s1381_s1 + $0x58] sm:$0xff]   ;;  %v1184_v27 = vld [vmem:[%s1381_s1 + $0x40] sm:$0xff]   ;;  %v1185_v34 = vld [vmem:[%s1381_s1 + $0x50] sm:$0xff]  }
   0xf   : > { %1096 = vmatprep.subr.bf16.mxu1 %v1204_v1  ;;  %1098 = vmatprep.mubr.msk.bf16.mxu1 %vm1205_vm0, %v1204_v1  ;;  %v1173_v7 = vld [vmem:[%s1274_s8 + $0xc] sm:$0x1f]   ;;  %v226_v8 = vld [vmem:[%s1274_s8] sm:$0xf]  ;;  %v227_v9 = vld [vmem:[%s1274_s8 + $0x4] sm:$0x1] }
  0x10   : > { %v363_v10 = vld [vmem:[%s1274_s8 + $0x4] sm:$0x3]  ;;  %v986_v11 = vcombine.low %v226_v8, %v227_v9  ;;  %v998_v14 = vld [vmem:[%s1274_s8 + $0x18] sm:$0xf]  ;;  %v1018_v15 = vld [vmem:[%s1274_s8 + $0x1c] sm:$0x3] }
  0x11   : > { %1089 = vmatpush3.bf16.msra.mxu0 %v1171_v3  ;;  %v994_v12 = vcombine.low %v226_v8, %v363_v10  ;;  %v1023_v17 = vcombine.low %v998_v14, %v1018_v15  ;;  %v999_v20 = vld [vmem:[%s1274_s8 + $0x1c] sm:$0x1]  ;;  %v653_v30 = vld [vmem:[%s1274_s8] sm:$0xc]  ;;  %v654_v31 = vld [vmem:[%s1274_s8 + $0x4] sm:$0xf] }
  0x12   : > { %1097 = vmatpush3.bf16.msra.mxu1 %v1172_v4  ;;  %1102 = vmatprep.subr.bf16.mxu0 %v1204_v1  ;;  %v1004_v25 = vcombine.low %v998_v14, %v999_v20  ;;  %v1031_v32 = vcombine.low %v653_v30, %v654_v31  ;;  %v1192_v33 = vld [vmem:[%s1274_s8 + $0xc] sm:$0xfc]   ;;  %v1186_v35 = vld [vmem:[%s1274_s8 + $0x24] sm:$0x1f]   ;;  %v1188_v42 = vld [vmem:[%s1381_s1 + $0x78] sm:$0xff]  }
  0x13   : > { %1110 = vmatprep.subr.bf16.mxu1 %v1204_v1  ;;  %v373_v18 = vshrl.u32 %v994_v12, 16  ;;  %v375_v19 = vshll.u32 %v994_v12, 16  ;;  %v591_v23 = vshll.u32 %v1023_v17, 16  ;;  %v589_v28 = vshrl.u32 %v1023_v17, 16  ;;  %v1187_v38 = vld [vmem:[%s1381_s1 + $0x68] sm:$0xff]   ;;  %v1189_v45 = vld [vmem:[%s1381_s1 + $0x60] sm:$0xff]  }
  0x14   : > { %1091 = vmatmul.mubr.msk.bf16.vlgmr.msra.gmra.mxu0 %vm257_vm1, %v1173_v7  ;;  %v666_v36 = vshrl.u32 %v1031_v32, 16  ;;  %v669_v37 = vshll.u32 %v1031_v32, 16  ;;  %v744_v40 = vshrl.u32 %v1192_v33, 16  ;;  %v747_v41 = vshll.u32 %v1192_v33, 16  ;;  %v1190_v48 = vld [vmem:[%s1381_s1 + $0x70] sm:$0xff]   ;;  %v1193_v50 = vld [vmem:[%s1381_s1 + $0x88] sm:$0xff]  }
  0x15   : > { %1103 = vmatpush3.bf16.msra.mxu0 %v1176_v5  ;;  %1106 = vmatprep.mubr.msk.bf16.mxu0 %vm1205_vm0, %v1204_v1  ;;  %v377_v21 = vrot.slane %v375_v19, 1  ;;  %v593_v29 = vrot.slane %v591_v23, 1  ;;  %v809_v51 = vld [vmem:[%s1274_s8] sm:$0x8] }
  0x16   : > { %1099 = vmatmul.mubr.msk.bf16.vlgmr.msra.gmra.mxu1 %vm257_vm1, %v986_v11  ;;  %1104 = vmatprep.subr.bf16.mxu0 %v1204_v1  ;;  %v668_v43 = vrot.slane %v666_v36, 2  ;;  %v671_v44 = vrot.slane %v669_v37, 3  ;;  %v746_v46 = vrot.slane %v744_v40, 2  ;;  %v749_v47 = vrot.slane %v747_v41, 3  ;;  %v1194_v54 = vld [vmem:[%s1381_s1 + $0x80] sm:$0xff]  }
  0x17   : > { %1111 = vmatpush3.bf16.msra.mxu1 %v1177_v6  ;;  %1114 = vmatprep.mubr.msk.bf16.mxu1 %vm1205_vm0, %v1204_v1  ;;  %v378_v24 = vor.u32 %v377_v21, %v373_v18  ;;  %v594_v39 = vor.u32 %v593_v29, %v589_v28  ;;  %v1049_v53 = vcombine.low %v809_v51, %v654_v31 }
  0x18   : > { %1112 = vmatprep.subr.bf16.mxu1 %v1204_v1  ;;  %v672_v49 = vor.u32 %v671_v44, %v668_v43  ;;  %v750_v52 = vor.u32 %v749_v47, %v746_v46 }
  0x19   : > { %1105 = vmatpush3.bf16.msra.mxu0 %v1178_v13  ;;  %v818_v55 = vrot.slane %v1049_v53, 3 }
  0x1a   : > { %1118 = vmatprep.subr.bf16.mxu0 %v1204_v1 }
  0x1b   : > { %1113 = vmatpush3.bf16.msra.mxu1 %v1179_v16 }
  0x1c   : > { %1107 = vmatmul.mubr.msk.bf16.vlgmr.msra.gmra.mxu0 %vm257_vm1, %v378_v24  ;;  %1126 = vmatprep.subr.bf16.mxu1 %v1204_v1 }
  0x1d   : > { %1119 = vmatpush3.bf16.msra.mxu0 %v1182_v22  ;;  %1122 = vmatprep.mubr.msk.bf16.mxu0 %vm1205_vm0, %v1204_v1 }
  0x1e   : > { %1115 = vmatmul.mubr.msk.bf16.vlgmr.msra.gmra.mxu1 %vm257_vm1, %v1004_v25  ;;  %1120 = vmatprep.subr.bf16.mxu0 %v1204_v1 }
  0x1f   : > { %1127 = vmatpush3.bf16.msra.mxu1 %v1183_v26  ;;  %1130 = vmatprep.mubr.msk.bf16.mxu1 %vm1205_vm0, %v1204_v1 }
  0x20   : > { %1128 = vmatprep.subr.bf16.mxu1 %v1204_v1 }
  0x21   : > { %1121 = vmatpush3.bf16.msra.mxu0 %v1184_v27 }
  0x22   : > { %1134 = vmatprep.subr.bf16.mxu0 %v1204_v1 }
  0x23   : > { %1129 = vmatpush3.bf16.msra.mxu1 %v1185_v34 }
  0x24   : > { %1123 = vmatmul.mubr.msk.bf16.vlgmr.msra.gmra.mxu0 %vm257_vm1, %v1186_v35  ;;  %1142 = vmatprep.subr.bf16.mxu1 %v1204_v1 }
  0x25   : > { %1135 = vmatpush3.bf16.msra.mxu0 %v1187_v38  ;;  %1138 = vmatprep.mubr.msk.bf16.mxu0 %vm1205_vm0, %v1204_v1  ;;  %v1053_v38 = vld [vmem:[%s1382_s2] ss:$0 sm:$0xff] }
  0x26   : > { %1131 = vmatmul.mubr.msk.bf16.vlgmr.msra.gmra.mxu1 %vm257_vm1, %v594_v39  ;;  %1136 = vmatprep.subr.bf16.mxu0 %v1204_v1 }
  0x27   : > { %1143 = vmatpush3.bf16.msra.mxu1 %v1188_v42  ;;  %1146 = vmatprep.mubr.msk.bf16.mxu1 %vm1205_vm0, %v1204_v1 }
  0x28   : > { %1144 = vmatprep.subr.bf16.mxu1 %v1204_v1 }
  0x29   : > { %1137 = vmatpush3.bf16.msra.mxu0 %v1189_v45  ;;  %v1054_v45 = vld [vmem:[%s1383_s3] ss:$0 sm:$0xff] }
  0x2a   : > { %1150 = vmatprep.subr.bf16.mxu0 %v1204_v1 }
  0x2b   : > { %1145 = vmatpush3.bf16.msra.mxu1 %v1190_v48 }
  0x2c   : > { %1139 = vmatmul.mubr.msk.bf16.vlgmr.msra.gmra.mxu0 %vm257_vm1, %v672_v49  ;;  %v1055_v49 = vld [vmem:[%s1384_s4] ss:$0 sm:$0xff] }
  0x2d   : > { %1151 = vmatpush3.bf16.msra.mxu0 %v1193_v50  ;;  %1154 = vmatprep.mubr.msk.bf16.mxu0 %vm1205_vm0, %v1204_v1 }
  0x2e   : > { %1147 = vmatmul.mubr.msk.bf16.vlgmr.msra.gmra.mxu1 %vm257_vm1, %v750_v52  ;;  %1152 = vmatprep.subr.bf16.mxu0 %v1204_v1 }
  0x31   : > { %1153 = vmatpush3.bf16.msra.mxu0 %v1194_v54 }
  0x34   : > { %1155 = vmatmul.mubr.msk.bf16.vlgmr.msra.gmra.mxu0 %vm257_vm1, %v818_v55 }
  0xd4   : > { %v295_v56 = vpop.f32.mrf.mxu0 }
  0xd6   : > { %v356_v57 = vpop.f32.mrf.mxu1  ;;  %v1092_v58 = vpop.f32.mrf.mxu0 }
  0xd7   : > { %v357_v6 = vadd.f32 %v356_v57, %v295_v56 }
  0xd8   : > { %v1100_v59 = vpop.f32.mrf.mxu1  ;;  %v298_v60 = vpop.f32.mrf.mxu0 }
  0xda   : > { %v359_v61 = vpop.f32.mrf.mxu1  ;;  %v1093_v62 = vpop.f32.mrf.mxu0 }
  0xdb   : > { %v360_v11 = vadd.f32 %v359_v61, %v298_v60 }
  0xdc   : > { %v1101_v63 = vpop.f32.mrf.mxu1  ;;  %v428_v0 = vpop.f32.mrf.mxu0 }
  0xdd   : > { %v435_v8 = vadd.f32 %v428_v0, %v357_v6 }
  0xde   : > { %v499_v2 = vpop.f32.mrf.mxu1  ;;  %v1108_v3 = vpop.f32.mrf.mxu0 }
  0xdf   : > { %v506_v14 = vadd.f32 %v499_v2, %v435_v8 }
  0xe0   : > { %v1116_v4 = vpop.f32.mrf.mxu1  ;;  %v431_v5 = vpop.f32.mrf.mxu0 }
  0xe1   : > { %v436_v15 = vadd.f32 %v431_v5, %v360_v11 }
  0xe2   : > { %v502_v7 = vpop.f32.mrf.mxu1  ;;  %v1109_v1 = vpop.f32.mrf.mxu0 }
  0xe3   : > { %v507_v21 = vadd.f32 %v502_v7, %v436_v15 }
  0xe4   : > { %v1117_v9 = vpop.f32.mrf.mxu1  ;;  %v570_v10 = vpop.f32.mrf.mxu0 }
  0xe5   : > { %v577_v18 = vadd.f32 %v570_v10, %v506_v14 }
  0xe6   : > { %v644_v12 = vpop.f32.mrf.mxu1  ;;  %v1124_v13 = vpop.f32.mrf.mxu0 }
  0xe7   : > { %v651_v24 = vadd.f32 %v644_v12, %v577_v18 }
  0xe8   : > { %v1132_v16 = vpop.f32.mrf.mxu1  ;;  %v573_v17 = vpop.f32.mrf.mxu0 }
  0xe9   : > { %v578_v25 = vadd.f32 %v573_v17, %v507_v21 }
  0xea   : > { %v647_v19 = vpop.f32.mrf.mxu1  ;;  %v1125_v20 = vpop.f32.mrf.mxu0 }
  0xeb   : > { %v652_v31 = vadd.f32 %v647_v19, %v578_v25 }
  0xec   : > { %v1133_v22 = vpop.f32.mrf.mxu1  ;;  %v722_v23 = vpop.f32.mrf.mxu0 }
  0xed   : > { %v729_v28 = vadd.f32 %v722_v23, %v651_v24 }
  0xee   : > { %v800_v26 = vpop.f32.mrf.mxu1  ;;  %v1140_v27 = vpop.f32.mrf.mxu0 }
  0xef   : > { %v807_v34 = vadd.f32 %v800_v26, %v729_v28 }
  0xf0   : > { %v1148_v29 = vpop.f32.mrf.mxu1  ;;  %v725_v30 = vpop.f32.mrf.mxu0 }
  0xf1   : > { %v730_v35 = vadd.f32 %v725_v30, %v652_v31 }
  0xf2   : > { %v803_v32 = vpop.f32.mrf.mxu1  ;;  %v1141_v33 = vpop.f32.mrf.mxu0 }
  0xf3   : > { %v808_v41 = vadd.f32 %v803_v32, %v730_v35 }
  0xf4   : > { %v1149_v36 = vpop.f32.mrf.mxu1  ;;  %v868_v37 = vpop.f32.mrf.mxu0 }
  0xf5   : > { %v875_v39 = vadd.f32 %v868_v37, %v807_v34 }
  0xf6   : > { %v1156_v40 = vpop.f32.mrf.mxu0 }
  0xf7   : > { %v884_v42 = vadd.f32 %v1053_v38, %v875_v39 }
  0xf8   : > { %v871_v43 = vpop.f32.mrf.mxu0 }
  0xf9   : > { %vm886_vm2 = vcmp.gt.f32.partialorder %v884_v42, 0.0  ;;  %v888_v44 = vmul.f32 0.2, %v884_v42  ;;  %v876_v46 = vadd.f32 %v871_v43, %v808_v41 }
  0xfa   : > { %v1157_v47 = vpop.f32.mrf.mxu0 }
  0xfb   : > { %v890_v48 = vsel %vm886_vm2, %v884_v42, %v888_v44  ;;  %v885_v50 = vadd.f32 %v1053_v38, %v876_v46 }
  0xfc   : > { %v899_v51 = vmul.f32 %v1054_v45, %v890_v48 }
  0xfd   : > { %vm887_vm3 = vcmp.gt.f32.partialorder %v885_v50, 0.0  ;;  %v889_v52 = vmul.f32 0.2, %v885_v50 }
  0xfe   : > { %v908_v53 = vadd.f32 %v1055_v49, %v899_v51 }
  0xff   : > { %v891_v54 = vsel %vm887_vm3, %v885_v50, %v889_v52 }
 0x100   : > { %910 = vst.msk [vmem:[%s224_s23] sm:$0xff] %vm257_vm1, %v908_v53  ;;  %v900_v55 = vmul.f32 %v1054_v45, %v891_v54 }
 0x102   : > { %v909_v56 = vadd.f32 %v1055_v49, %v900_v55 }
 0x104   : > { %912 = vst.msk [vmem:[%s224_s23 + $0x8] sm:$0x3] %vm911_vm4, %v909_v56 }
 0x105 PF: > { %s15_s18 = sadd.s32 1, %s1202_s18  }
 0x106   : > { %p12_p4 = scmp.ge.s32.totalorder %s15_s18, 4  }
 0x108   :  { %14 = sbr.rel (!%p12_p4) target bundleno = 1 (0x1), region = 81 }

// kernel: disc2d_forward.7
= control target key start
LH: loop header
LB: loop body
LE: loop exit
PB: predicated region body
PF: predicated region fallthrough
CT: control target
= control target key end

     0   :  { %v193_v0 = vmov 0.0   ;;  %vm194_vm0 = vmmov 0   ;;  %s248_s1 = inlined_call_operand.vmem [shape: bf16[128,128], index: 1, kind: input, shape index: {}]   ;;  %s249_s0 = inlined_call_operand.vmem [shape: bf16[2,128], index: 0, kind: input, shape index: {}]   ;;  %s250_s2 = inlined_call_operand.vmem [shape: f32[1,128], index: 2, kind: input, shape index: {}]   ;;  %s251_s3 = inlined_call_operand.vmem [shape: f32[2,128], index: 3, kind: output, shape index: {}]  }
   0x1   :  { %163 = vmatprep.subr.bf16.mxu0 %v193_v0  ;;  %19 = vst [vmem:[#allocation2] sm:$0x3] %v193_v0  ;;  %v185_v1 = vld [vmem:[%s248_s1 + $0x38] sm:$0xff]   ;;  %179 = vmatprep.mubr.msk.bf16.mxu0 %vm194_vm0, %v193_v0  ;;  %v186_v2 = vld [vmem:[%s248_s1 + $0x30] sm:$0xff]   ;;  %v187_v3 = vld [vmem:[%s248_s1 + $0x28] sm:$0xff]  }
   0x2   :  { %164 = vmatpush3.bf16.msra.mxu0 %v185_v1  ;;  %v188_v4 = vld [vmem:[%s248_s1 + $0x20] sm:$0xff]   ;;  %v189_v5 = vld [vmem:[%s248_s1 + $0x18] sm:$0xff]   ;;  %v190_v6 = vld [vmem:[%s248_s1 + $0x10] sm:$0xff]  }
   0x3   :  { %165 = vmatprep.subr.bf16.mxu0 %v193_v0  ;;  %v191_v7 = vld [vmem:[%s248_s1 + $0x8] sm:$0xff]   ;;  %v192_v8 = vld [vmem:[%s248_s1] sm:$0xff]  }
   0x4   :  { %v21_v9 = vld [vmem:[%s249_s0] sm:$0x1] }
   0x5   :  { %v153_v16 = vld [vmem:[%s250_s2] ss:$0 sm:$0xff] }
   0x6   :  { %166 = vmatpush3.bf16.msra.mxu0 %v186_v2 }
   0x7   :  { %167 = vmatprep.subr.bf16.mxu0 %v193_v0 }
   0x8   :  { %v20_v10 = vld [vmem:[#allocation2] sm:$0x3] }
   0xa   :  { %168 = vmatpush3.bf16.msra.mxu0 %v187_v3 }
   0xb   :  { %169 = vmatprep.subr.bf16.mxu0 %v193_v0 }
   0xe   :  { %170 = vmatpush3.bf16.msra.mxu0 %v188_v4 }
   0xf   :  { %171 = vmatprep.subr.bf16.mxu0 %v193_v0 }
  0x12   :  { %172 = vmatpush3.bf16.msra.mxu0 %v189_v5 }
  0x13   :  { %173 = vmatprep.subr.bf16.mxu0 %v193_v0 }
  0x16   :  { %174 = vmatpush3.bf16.msra.mxu0 %v190_v6 }
  0x17   :  { %175 = vmatprep.subr.bf16.mxu0 %v193_v0 }
  0x1a   :  { %176 = vmatpush3.bf16.msra.mxu0 %v191_v7 }
  0x1b   :  { %177 = vmatprep.subr.bf16.mxu0 %v193_v0 }
  0x1e   :  { %178 = vmatpush3.bf16.msra.mxu0 %v192_v8 }
  0x21   :  { %180 = vmatmul.mubr.bf16.vlgmr.msra.gmra.mxu0 %v21_v9 }
  0xe1   :  { %v120_v11 = vpop.f32.mrf.mxu0 }
  0xe2   :  { %v126_v12 = vadd.f32 %v120_v11, %v20_v10 }
  0xe3   :  { %v181_v13 = vpop.f32.mrf.mxu0 }
  0xe4   :  { %127 = vst [vmem:[#allocation2] sm:$0x3] %v126_v12 }
  0xe5   :  { %v123_v14 = vpop.f32.mrf.mxu0 }
  0xe7   :  { %v182_v15 = vpop.f32.mrf.mxu0 }
  0xeb   :  { %v131_v17 = vld [vmem:[#allocation2] sm:$0x3] }
  0xec   :  { %v139_v18 = vadd.f32 %v153_v16, %v131_v17 }
  0xee   :  { %140 = vst [vmem:[%s251_s3] sm:$0x3] %v139_v18 }

// kernel: disc2d_forward.6
= control target key start
LH: loop header
LB: loop body
LE: loop exit
PB: predicated region body
PF: predicated region fallthrough
CT: control target
= control target key end

     0   :  { %s1163_s18 = smov 0   ;;  %s1301_s0 = inlined_call_operand.vmem [shape: bf16[2,4,9,32], index: 0, kind: input, shape index: {}]   ;;  %s1302_s1 = inlined_call_operand.vmem [shape: bf16[9,32,32], index: 1, kind: input, shape index: {}]   ;;  %s1303_s2 = inlined_call_operand.vmem [shape: f32[1,32], index: 2, kind: input, shape index: {}]   ;;  %s1304_s3 = inlined_call_operand.vmem [shape: f32[1,32], index: 3, kind: input, shape index: {}]   ;;  %s1305_s4 = inlined_call_operand.vmem [shape: f32[1,32], index: 4, kind: input, shape index: {}]   ;;  %s1306_s5 = inlined_call_operand.vmem [shape: f32[2,3,32], index: 5, kind: output, shape index: {}]  }
   0x1 LB: > { %s909_s19 = sadd.s32 4294967295, %s1129_s18   ;;  %p913_p0 = scmp.ge.s32.totalorder %s1129_s18, 1  ;;  %s1129_s18 = sphi %s1163_s18, %s15_s18  }
   0x2   : > { %p187_p1 = scmp.lt.s32.totalorder %s1129_s18, 3 }
   0x4   : > { %p188_p2 = pnand %p913_p0, %p187_p1 }
   0x5   : > { %p214_p3 = scmp.lt.s32.totalorder (!%p188_p2), %s909_s19, 1 }
   0x6   : > { %191 = sbr.rel (%p188_p2) target bundleno = 257 (0x101), region = 40 }
   0xb   : > { %v1100_v0 = vld [vmem:[%s1302_s1 + $0x18] sm:$0xff]   ;;  %v1131_v1 = vmov 0.0   ;;  %v1101_v2 = vld [vmem:[%s1302_s1 + $0x8] sm:$0xff]   ;;  %v1102_v3 = vld [vmem:[%s1302_s1 + $0x10] sm:$0xff]   ;;  %vm1132_vm0 = vmmov 0   ;;  %s1308_s19 = smov (!%p214_p3, %s909_s19), 1 }
   0xc   : > { %1018 = vmatprep.subr.bf16.mxu0 %v1131_v1  ;;  %1026 = vmatprep.subr.bf16.mxu1 %v1131_v1  ;;  %v1103_v4 = vld [vmem:[%s1302_s1] sm:$0xff]   ;;  %vm248_vm1 = vcmask 261120   ;;  %s990_s28 = sshll.u32 %s1308_s19, 5  ;;  %v1105_v5 = vld [vmem:[%s1302_s1 + $0x28] sm:$0xff]   ;;  %v1106_v6 = vld [vmem:[%s1302_s1 + $0x38] sm:$0xff]   ;;  %s916_s16 = sshll.u32 %s1308_s19, 2 }
   0xd   : > { %1019 = vmatpush3.bf16.msra.mxu0 %v1100_v0  ;;  %1022 = vmatprep.mubr.msk.bf16.mxu0 %vm1132_vm0, %v1131_v1  ;;  %s1200_s8 = scalar_lea.vmem %s1301_s0, %s990_s28  ;;  %v1107_v11 = vld [vmem:[%s1302_s1 + $0x20] sm:$0xff]   ;;  %v1108_v15 = vld [vmem:[%s1302_s1 + $0x30] sm:$0xff]   ;;  %v1110_v18 = vld [vmem:[%s1302_s1 + $0x48] sm:$0xff]   ;;  %s222_s23 = scalar_lea.vmem %s1306_s5, %s916_s16  ;;  %vm854_vm3 = vcmask 256000  }
   0xe   : > { %1027 = vmatpush3.bf16.msra.mxu1 %v1101_v2  ;;  %1020 = vmatprep.subr.bf16.mxu0 %v1131_v1  ;;  %v917_v7 = vld [vmem:[%s1200_s8 + $0x8] sm:$0x3]  ;;  %v224_v8 = vld [vmem:[%s1200_s8] sm:$0x3]  ;;  %v936_v9 = vld [vmem:[%s1200_s8 + $0x10] sm:$0x3] }
   0xf   : > { %1028 = vmatprep.subr.bf16.mxu1 %v1131_v1  ;;  %1030 = vmatprep.mubr.msk.bf16.mxu1 %vm1132_vm0, %v1131_v1  ;;  %v932_v10 = vcombine.low %v224_v8, %v224_v8  ;;  %v956_v12 = vcombine.low %v936_v9, %v936_v9  ;;  %v1111_v20 = vld [vmem:[%s1302_s1 + $0x58] sm:$0xff]   ;;  %v1112_v22 = vld [vmem:[%s1302_s1 + $0x40] sm:$0xff]   ;;  %v1113_v25 = vld [vmem:[%s1302_s1 + $0x50] sm:$0xff]  }
  0x10   : > { %v1118_v24 = vld [vmem:[%s1200_s8] ss:$0 sps:$4 sm:$0x66]   ;;  %v1119_v26 = vld [vmem:[%s1200_s8 + $0x8] ss:$0 sps:$4 sm:$0x66]  }
  0x11   : > { %1021 = vmatpush3.bf16.msra.mxu0 %v1102_v3  ;;  %v356_v13 = vshrl.u32 %v932_v10, 16  ;;  %v358_v14 = vshll.u32 %v932_v10, 16  ;;  %v555_v17 = vshll.u32 %v956_v12, 16  ;;  %v553_v21 = vshrl.u32 %v956_v12, 16  ;;  %v1114_v27 = vld [vmem:[%s1302_s1 + $0x68] sm:$0xff]   ;;  %v1115_v34 = vld [vmem:[%s1302_s1 + $0x78] sm:$0xff]  }
  0x12   : > { %1029 = vmatpush3.bf16.msra.mxu1 %v1103_v4  ;;  %1034 = vmatprep.subr.bf16.mxu0 %v1131_v1  ;;  %v625_v28 = vshrl.u32 %v1118_v24, 16  ;;  %v628_v29 = vshll.u32 %v1118_v24, 16  ;;  %v944_v31 = vld [vmem:[%s1200_s8 + $0x18] sm:$0x3]  ;;  %v698_v32 = vshrl.u32 %v1119_v26, 16  ;;  %v701_v33 = vshll.u32 %v1119_v26, 16 }
  0x13   : > { %1042 = vmatprep.subr.bf16.mxu1 %v1131_v1  ;;  %v360_v16 = vrot.slane %v358_v14, 1  ;;  %v557_v23 = vrot.slane %v555_v17, 1  ;;  %v1116_v37 = vld [vmem:[%s1302_s1 + $0x60] sm:$0xff]   ;;  %v1117_v40 = vld [vmem:[%s1302_s1 + $0x70] sm:$0xff]   ;;  %v1120_v43 = vld [vmem:[%s1302_s1 + $0x88] sm:$0xff]  }
  0x14   : > { %1023 = vmatmul.mubr.msk.bf16.vlgmr.msra.gmra.mxu0 %vm248_vm1, %v917_v7  ;;  %v627_v35 = vrot.slane %v625_v28, 1  ;;  %v630_v36 = vrot.slane %v628_v29, 2  ;;  %v700_v38 = vrot.slane %v698_v32, 1  ;;  %v703_v39 = vrot.slane %v701_v33, 2  ;;  %v1121_v45 = vld [vmem:[%s1302_s1 + $0x80] sm:$0xff]  }
  0x15   : > { %1031 = vmatmul.mubr.msk.bf16.vlgmr.msra.gmra.mxu1 %vm248_vm1, %v224_v8  ;;  %1035 = vmatpush3.bf16.msra.mxu0 %v1105_v5  ;;  %v361_v19 = vor.u32 %v360_v16, %v356_v13  ;;  %v558_v30 = vor.u32 %v557_v23, %v553_v21  ;;  %v1122_v44 = vld [vmem:[%s1200_s8] ss:$0 sps:$4 sm:$0xcc]  }
  0x16   : > { %1043 = vmatpush3.bf16.msra.mxu1 %v1106_v6  ;;  %1036 = vmatprep.subr.bf16.mxu0 %v1131_v1  ;;  %v631_v41 = vor.u32 %v630_v36, %v627_v35  ;;  %v704_v42 = vor.u32 %v703_v39, %v700_v38  ;;  %v770_v46 = vrot.slane %v1122_v44, 2  ;;  %v985_v23 = vld [vmem:[%s1303_s2] ss:$0 sm:$0xff] }
  0x17   : > { %1044 = vmatprep.subr.bf16.mxu1 %v1131_v1  ;;  %1038 = vmatprep.mubr.msk.bf16.mxu0 %vm1132_vm0, %v1131_v1  ;;  %v986_v29 = vld [vmem:[%s1304_s3] ss:$0 sm:$0xff] }
  0x18   : > { %1046 = vmatprep.mubr.msk.bf16.mxu1 %vm1132_vm0, %v1131_v1  ;;  %v987_v32 = vld [vmem:[%s1305_s4] ss:$0 sm:$0xff] }
  0x19   : > { %1037 = vmatpush3.bf16.msra.mxu0 %v1107_v11 }
  0x1a   : > { %1045 = vmatpush3.bf16.msra.mxu1 %v1108_v15  ;;  %1050 = vmatprep.subr.bf16.mxu0 %v1131_v1 }
  0x1b   : > { %1058 = vmatprep.subr.bf16.mxu1 %v1131_v1 }
  0x1c   : > { %1039 = vmatmul.mubr.msk.bf16.vlgmr.msra.gmra.mxu0 %vm248_vm1, %v361_v19 }
  0x1d   : > { %1047 = vmatmul.mubr.msk.bf16.vlgmr.msra.gmra.mxu1 %vm248_vm1, %v936_v9  ;;  %1051 = vmatpush3.bf16.msra.mxu0 %v1110_v18 }
  0x1e   : > { %1059 = vmatpush3.bf16.msra.mxu1 %v1111_v20  ;;  %1052 = vmatprep.subr.bf16.mxu0 %v1131_v1 }
  0x1f   : > { %1060 = vmatprep.subr.bf16.mxu1 %v1131_v1  ;;  %1054 = vmatprep.mubr.msk.bf16.mxu0 %vm1132_vm0, %v1131_v1 }
  0x20   : > { %1062 = vmatprep.mubr.msk.bf16.mxu1 %vm1132_vm0, %v1131_v1 }
  0x21   : > { %1053 = vmatpush3.bf16.msra.mxu0 %v1112_v22 }
  0x22   : > { %1061 = vmatpush3.bf16.msra.mxu1 %v1113_v25  ;;  %1066 = vmatprep.subr.bf16.mxu0 %v1131_v1 }
  0x23   : > { %1074 = vmatprep.subr.bf16.mxu1 %v1131_v1 }
  0x24   : > { %1055 = vmatmul.mubr.msk.bf16.vlgmr.msra.gmra.mxu0 %vm248_vm1, %v944_v31 }
  0x25   : > { %1063 = vmatmul.mubr.msk.bf16.vlgmr.msra.gmra.mxu1 %vm248_vm1, %v558_v30  ;;  %1067 = vmatpush3.bf16.msra.mxu0 %v1114_v27 }
  0x26   : > { %1075 = vmatpush3.bf16.msra.mxu1 %v1115_v34  ;;  %1068 = vmatprep.subr.bf16.mxu0 %v1131_v1 }
  0x27   : > { %1076 = vmatprep.subr.bf16.mxu1 %v1131_v1  ;;  %1070 = vmatprep.mubr.msk.bf16.mxu0 %vm1132_vm0, %v1131_v1 }
  0x28   : > { %1078 = vmatprep.mubr.msk.bf16.mxu1 %vm1132_vm0, %v1131_v1 }
  0x29   : > { %1069 = vmatpush3.bf16.msra.mxu0 %v1116_v37 }
  0x2a   : > { %1077 = vmatpush3.bf16.msra.mxu1 %v1117_v40  ;;  %1082 = vmatprep.subr.bf16.mxu0 %v1131_v1 }
  0x2c   : > { %1071 = vmatmul.mubr.msk.bf16.vlgmr.msra.gmra.mxu0 %vm248_vm1, %v631_v41 }
  0x2d   : > { %1079 = vmatmul.mubr.msk.bf16.vlgmr.msra.gmra.mxu1 %vm248_vm1, %v704_v42  ;;  %1083 = vmatpush3.bf16.msra.mxu0 %v1120_v43 }
  0x2e   : > { %1084 = vmatprep.subr.bf16.mxu0 %v1131_v1  ;;  %1086 = vmatprep.mubr.msk.bf16.mxu0 %vm1132_vm0, %v1131_v1 }
  0x31   : > { %1085 = vmatpush3.bf16.msra.mxu0 %v1121_v45 }
  0x34   : > { %1087 = vmatmul.mubr.msk.bf16.vlgmr.msra.gmra.mxu0 %vm248_vm1, %v770_v46 }
  0xd4   : > { %v286_v47 = vpop.f32.mrf.mxu0 }
  0xd5   : > { %v341_v48 = vpop.f32.mrf.mxu1 }
  0xd6   : > { %v1024_v49 = vpop.f32.mrf.mxu0  ;;  %v342_v60 = vadd.f32 %v341_v48, %v286_v47 }
  0xd7   : > { %v1032_v50 = vpop.f32.mrf.mxu1 }
  0xd8   : > { %v289_v51 = vpop.f32.mrf.mxu0 }
  0xd9   : > { %v344_v52 = vpop.f32.mrf.mxu1 }
  0xda   : > { %v1025_v53 = vpop.f32.mrf.mxu0 }
  0xdb   : > { %v1033_v54 = vpop.f32.mrf.mxu1 }
  0xdc   : > { %v411_v55 = vpop.f32.mrf.mxu0 }
  0xdd   : > { %v474_v56 = vpop.f32.mrf.mxu1  ;;  %v417_v63 = vadd.f32 %v411_v55, %v342_v60 }
  0xde   : > { %v1040_v57 = vpop.f32.mrf.mxu0 }
  0xdf   : > { %v1048_v58 = vpop.f32.mrf.mxu1  ;;  %v480_v4 = vadd.f32 %v474_v56, %v417_v63 }
  0xe0   : > { %v414_v59 = vpop.f32.mrf.mxu0 }
  0xe1   : > { %v477_v61 = vpop.f32.mrf.mxu1 }
  0xe2   : > { %v1041_v62 = vpop.f32.mrf.mxu0 }
  0xe3   : > { %v1049_v0 = vpop.f32.mrf.mxu1 }
  0xe4   : > { %v537_v1 = vpop.f32.mrf.mxu0 }
  0xe5   : > { %v608_v2 = vpop.f32.mrf.mxu1  ;;  %v543_v7 = vadd.f32 %v537_v1, %v480_v4 }
  0xe6   : > { %v1056_v3 = vpop.f32.mrf.mxu0 }
  0xe7   : > { %v1064_v5 = vpop.f32.mrf.mxu1  ;;  %v614_v12 = vadd.f32 %v608_v2, %v543_v7 }
  0xe8   : > { %v540_v6 = vpop.f32.mrf.mxu0 }
  0xe9   : > { %v611_v8 = vpop.f32.mrf.mxu1 }
  0xea   : > { %v1057_v9 = vpop.f32.mrf.mxu0 }
  0xeb   : > { %v1065_v10 = vpop.f32.mrf.mxu1 }
  0xec   : > { %v681_v11 = vpop.f32.mrf.mxu0 }
  0xed   : > { %v754_v13 = vpop.f32.mrf.mxu1  ;;  %v687_v15 = vadd.f32 %v681_v11, %v614_v12 }
  0xee   : > { %v1072_v14 = vpop.f32.mrf.mxu0 }
  0xef   : > { %v1080_v16 = vpop.f32.mrf.mxu1  ;;  %v760_v20 = vadd.f32 %v754_v13, %v687_v15 }
  0xf0   : > { %v684_v17 = vpop.f32.mrf.mxu0 }
  0xf1   : > { %v757_v18 = vpop.f32.mrf.mxu1 }
  0xf2   : > { %v1073_v19 = vpop.f32.mrf.mxu0 }
  0xf3   : > { %v1081_v21 = vpop.f32.mrf.mxu1 }
  0xf4   : > { %v820_v22 = vpop.f32.mrf.mxu0 }
  0xf5   : > { %v826_v24 = vadd.f32 %v820_v22, %v760_v20 }
  0xf6   : > { %v1088_v25 = vpop.f32.mrf.mxu0 }
  0xf7   : > { %v834_v26 = vadd.f32 %v985_v23, %v826_v24 }
  0xf8   : > { %v823_v27 = vpop.f32.mrf.mxu0 }
  0xf9   : > { %vm835_vm2 = vcmp.gt.f32.partialorder %v834_v26, 0.0  ;;  %v836_v28 = vmul.f32 0.2, %v834_v26 }
  0xfa   : > { %v1089_v30 = vpop.f32.mrf.mxu0 }
  0xfb   : > { %v837_v31 = vsel %vm835_vm2, %v834_v26, %v836_v28 }
  0xfc   : > { %v845_v33 = vmul.f32 %v986_v29, %v837_v31 }
  0xfe   : > { %v853_v34 = vadd.f32 %v987_v32, %v845_v33 }
 0x100   : > { %855 = vst.msk [vmem:[%s222_s23] sm:$0x7] %vm854_vm3, %v853_v34 }
 0x101 PF: > { %s15_s18 = sadd.s32 1, %s1129_s18  }
 0x102   : > { %p12_p4 = scmp.ge.s32.totalorder %s15_s18, 4  }
 0x104   :  { %14 = sbr.rel (!%p12_p4) target bundleno = 1 (0x1), region = 81 }

</bundles_post_ra>
